<compile_context>
chip_gen: v7x
topology: tpu7x:2x2x1
jax: 0.10.0
libtpu: 0.0.40
codegen_flags: <defaults>
</compile_context>

<pallas_src>
import math
import functools

import jax
import jax.numpy as jnp
from jax.experimental import pallas as pl
from jax.experimental.pallas import tpu as pltpu


LANE = 128


def _round_up(x, m):
    return ((x + m - 1) // m) * m


# ----------------------------- fused Pallas kernel --------------------------

def _fused_kernel(idx_ref, x_ref, *refs, num_layers, inv_m):
    """Full TMPHN forward for all nodes in one shot (everything VMEM-resident).

    idx_ref : [Np, M]   int32 neighbor-index table (hyperedge neighbors per node)
    x_ref   : [Np, Dp]  f32   node features, all dims zero-padded to 128 lanes
    refs    : (W_1..W_L bf16, W_out bf16, b [1, Cp] f32 with -1e30 on padded
               class lanes, out [Np, Cp] f32)
    """
    layer_refs = refs[:num_layers]
    wo_ref = refs[num_layers]
    b_ref = refs[num_layers + 1]
    o_ref = refs[num_layers + 2]

    n = x_ref.shape[0]          # padded node count (multiple of 128)
    m = idx_ref.shape[1]

    # Build the (unnormalized) 0/1 aggregation matrix from the neighbor table.
    # Only O(N*M) index data came from HBM; counts <= M are exact in bf16.
    # Kept in f32 during accumulation (v5e has no bf16 VALU), cast once at the end.
    neig = idx_ref[...]                                           # [Np, M] int32
    col = jax.lax.broadcasted_iota(jnp.int32, (n, n), 1)          # [Np, Np]
    cnt = jnp.zeros((n, n), dtype=jnp.float32)
    for j in range(m):                                            # M is tiny, unrolled
        cnt = cnt + (neig[:, j:j + 1] == col).astype(jnp.float32)
    a_bf = cnt.astype(jnp.bfloat16)                               # exact small integers

    # Stacked mean-aggregation layers: H <- relu( ((A @ H) * 1/M) @ W_l )
    # 1/M applied in f32 after the MXU matmul (exact for any M).
    h = x_ref[...]                                                # f32
    for l in range(num_layers):
        agg = jnp.dot(a_bf, h.astype(jnp.bfloat16),
                      preferred_element_type=jnp.float32) * inv_m
        h = jnp.maximum(
            jnp.dot(agg.astype(jnp.bfloat16), layer_refs[l][...],
                    preferred_element_type=jnp.float32),
            0.0)

    # Classifier head: log_softmax(H @ W + b).  Padded class lanes are masked
    # via the bias (W_out padded columns are zero, bias there is -1e30), so no
    # in-kernel iota/select is needed.
    logits = jnp.dot(h.astype(jnp.bfloat16), wo_ref[...],
                     preferred_element_type=jnp.float32) + b_ref[...]
    mx = jnp.max(logits, axis=-1, keepdims=True)
    e = jnp.exp(logits - mx)
    lse = jnp.log(jnp.sum(e, axis=-1, keepdims=True)) + mx
    o_ref[...] = logits - lse


# ----------------------------- wrapper ---------------------------------------

def tmphn_forward(neig_idx, x, layer_weights, w_out, b_out):
    """Fused TMPHN forward.  Returns log-probabilities [N, num_classes]."""
    n, din = x.shape
    m = int(neig_idx.shape[1])
    c = int(w_out.shape[1])
    num_layers = len(layer_weights)

    # Node axis padded to a multiple of 128 so the in-kernel aggregation matrix
    # is lane-dense and the A@H contraction is a full K=128 MXU pass.
    n_p = _round_up(n, LANE)
    din_p = _round_up(din, LANE)
    c_p = _round_up(c, LANE)

    # Lane-dense padding (zero columns / rows are exact no-ops through the math;
    # padded rows only ever read real rows, and are sliced away at the end).
    x_p = jnp.pad(x.astype(jnp.float32), ((0, n_p - n), (0, din_p - din)))
    idx_p = jnp.pad(neig_idx.astype(jnp.int32), ((0, n_p - n), (0, 0)))

    ws_p = []
    prev_p = din_p
    for w in layer_weights:
        dout_p = _round_up(int(w.shape[1]), LANE)
        w_p = jnp.pad(w, ((0, prev_p - w.shape[0]), (0, dout_p - w.shape[1])))
        ws_p.append(w_p.astype(jnp.bfloat16))
        prev_p = dout_p

    wo_p = jnp.pad(w_out, ((0, prev_p - w_out.shape[0]), (0, c_p - c))).astype(jnp.bfloat16)
    # Bake the padded-class mask into the bias: padded W_out columns are zero,
    # so padded logits become exactly -1e30 and vanish in the softmax.
    b_p = jnp.pad(b_out.reshape(1, c).astype(jnp.float32), ((0, 0), (0, c_p - c)),
                  constant_values=-1e30)

    kernel = functools.partial(
        _fused_kernel, num_layers=num_layers, inv_m=1.0 / m)

    # TODO(synk): a fixed 1/M denominator assumes every node has exactly M
    #             neighbors; for variable-cardinality hyperedges divide by the
    #             true per-row degree instead.
    out_p = pl.pallas_call(
        kernel,
        out_shape=jax.ShapeDtypeStruct((n_p, c_p), jnp.float32),
        grid=(1,),  # toy N fits in a single step; all operands VMEM-resident
        in_specs=[
            pl.BlockSpec((n_p, m), lambda i: (0, 0)),        # neighbor table
            pl.BlockSpec((n_p, din_p), lambda i: (0, 0)),    # node features
            *[pl.BlockSpec(w.shape, lambda i: (0, 0)) for w in ws_p],
            pl.BlockSpec(wo_p.shape, lambda i: (0, 0)),
            pl.BlockSpec((1, c_p), lambda i: (0, 0)),
        ],
        out_specs=pl.BlockSpec((n_p, c_p), lambda i: (0, 0)),
        compiler_params=pltpu.CompilerParams(
            dimension_semantics=("arbitrary",),
            vmem_limit_bytes=16 * 1024 * 1024,               # footprint < 1 MiB
        ),
    )(idx_p, x_p, *ws_p, wo_p, b_p)

    return out_p[:n, :c]


# ----------------------------- reference (plain JAX, f32) --------------------

def tmphn_reference(neig_idx, x, layer_weights, w_out, b_out):
    n, m = neig_idx.shape
    a = jnp.zeros((n, n), jnp.float32).at[
        jnp.repeat(jnp.arange(n), m), neig_idx.reshape(-1)].add(1.0 / m)
    h = x
    for w in layer_weights:
        h = jnp.maximum((a @ h) @ w, 0.0)
    logits = h @ w_out + b_out
    return jax.nn.log_softmax(logits, axis=1)


# ----------------------------- setup ------------------------------------------

if __name__ == "__main__":
    # Small, deterministic config (mirrors args / __init__ shapes).
    N = 64               # number of nodes (X.shape[0])
    INPUT_DIM = 16       # args.input_dim == X.shape[1]
    HID_DIM = 32         # args.hid_dim
    NUM_CLASSES = 8      # args.num_classes
    NUM_LAYERS = 2       # args.num_layers == len(args.Mlst)
    M = 4                # max hyperedge cardinality per node (Mlst entries)

    key = jax.random.PRNGKey(0)
    k_x, k_w1, k_w2, k_W, k_b = jax.random.split(key, 5)

    # Node feature matrix X (frozen nn.Embedding weight).
    X = jax.random.normal(k_x, (N, INPUT_DIM), dtype=jnp.float32)

    # Deterministic neig_dict flattened into a fixed [N, M] neighbor table:
    # node i's hyperedge neighbors are {(i+1)%N, ..., (i+M)%N}.
    neig_idx = ((jnp.arange(N)[:, None] + jnp.arange(1, M + 1)[None, :]) % N).astype(jnp.int32)

    # Encoder layer weights (deterministic init, uniform +- 1/sqrt(fan_in)).
    def uni(k, shape, fan_in):
        s = 1.0 / math.sqrt(fan_in)
        return jax.random.uniform(k, shape, jnp.float32, -s, s)

    W1 = uni(k_w1, (INPUT_DIM, HID_DIM), INPUT_DIM)
    W2 = uni(k_w2, (HID_DIM, HID_DIM), HID_DIM)
    layer_weights = [W1, W2][:NUM_LAYERS]

    # Classifier parameters: uniform(-1/sqrt(out_dim), 1/sqrt(out_dim)),
    # matching TMPHN.reset_parameters().
    std = 1.0 / math.sqrt(NUM_CLASSES)
    W_out = jax.random.uniform(k_W, (HID_DIM, NUM_CLASSES), jnp.float32, -std, std)
    b_out = jax.random.uniform(k_b, (NUM_CLASSES,), jnp.float32, -std, std)

    out = tmphn_forward(neig_idx, X, layer_weights, W_out, b_out)
    out = jax.block_until_ready(out)

    ref = tmphn_reference(neig_idx, X, layer_weights, W_out, b_out)
    assert out.shape == (N, NUM_CLASSES)
    # bf16 MXU operands with f32 accumulation -> compare with bf16-appropriate tolerance.
    assert jnp.allclose(out, ref, atol=3e-2, rtol=3e-2), (
        "mismatch vs JAX reference, max abs err = %f" % float(jnp.max(jnp.abs(out - ref))))

    print("KERNEL_OK")
</pallas_src>

<mosaic_0001>
module attributes {stable_mosaic.version = 11 : i64} {
  func.func @_fused_kernel(%arg0: i32, %arg1: memref<128x4xi32, #tpu.memory_space<vmem>>, %arg2: memref<128x128xf32, #tpu.memory_space<vmem>>, %arg3: memref<128x128xbf16, #tpu.memory_space<vmem>>, %arg4: memref<128x128xbf16, #tpu.memory_space<vmem>>, %arg5: memref<128x128xbf16, #tpu.memory_space<vmem>>, %arg6: memref<1x128xf32, #tpu.memory_space<vmem>>, %arg7: memref<128x128xf32, #tpu.memory_space<vmem>>) attributes {dimension_semantics = [#tpu.dimension_semantics<arbitrary>], iteration_bounds = array<i64: 1>, scalar_prefetch = 0 : i64, scratch_operands = 0 : i64, tpu.core_type = #tpu.core_type<tc>, window_params = [{pipeline_mode = #tpu.pipeline_mode<synchronous>, transform_indices = @transform_0, window_bounds = array<i64: 128, 4>}, {pipeline_mode = #tpu.pipeline_mode<synchronous>, transform_indices = @transform_1, window_bounds = array<i64: 128, 128>}, {pipeline_mode = #tpu.pipeline_mode<synchronous>, transform_indices = @transform_2, window_bounds = array<i64: 128, 128>}, {pipeline_mode = #tpu.pipeline_mode<synchronous>, transform_indices = @transform_3, window_bounds = array<i64: 128, 128>}, {pipeline_mode = #tpu.pipeline_mode<synchronous>, transform_indices = @transform_4, window_bounds = array<i64: 128, 128>}, {pipeline_mode = #tpu.pipeline_mode<synchronous>, transform_indices = @transform_5, window_bounds = array<i64: 1, 128>}, {pipeline_mode = #tpu.pipeline_mode<synchronous>, transform_indices = @transform_6, window_bounds = array<i64: 128, 128>}]} {
    %c0 = arith.constant 0 : index
    %c0_0 = arith.constant 0 : index
    %0 = vector.load %arg1[%c0, %c0_0] : memref<128x4xi32, #tpu.memory_space<vmem>>, vector<128x4xi32>
    %1 = tpu.iota {dimensions = array<i32: 1>} : vector<128x128xi32>
    %cst = arith.constant 0.000000e+00 : f32
    %2 = vector.broadcast %cst : f32 to vector<128x128xf32>
    %3 = vector.extract_strided_slice %0 {offsets = [0, 0], sizes = [128, 1], strides = [1, 1]} : vector<128x4xi32> to vector<128x1xi32>
    %4 = vector.broadcast %3 : vector<128x1xi32> to vector<128x128xi32>
    %5 = arith.cmpi eq, %4, %1 : vector<128x128xi32>
    %6 = arith.extui %5 : vector<128x128xi1> to vector<128x128xi32>
    %7 = arith.sitofp %6 : vector<128x128xi32> to vector<128x128xf32>
    %8 = arith.addf %2, %7 : vector<128x128xf32>
    %9 = vector.extract_strided_slice %0 {offsets = [0, 1], sizes = [128, 1], strides = [1, 1]} : vector<128x4xi32> to vector<128x1xi32>
    %10 = vector.broadcast %9 : vector<128x1xi32> to vector<128x128xi32>
    %11 = arith.cmpi eq, %10, %1 : vector<128x128xi32>
    %12 = arith.extui %11 : vector<128x128xi1> to vector<128x128xi32>
    %13 = arith.sitofp %12 : vector<128x128xi32> to vector<128x128xf32>
    %14 = arith.addf %8, %13 : vector<128x128xf32>
    %15 = vector.extract_strided_slice %0 {offsets = [0, 2], sizes = [128, 1], strides = [1, 1]} : vector<128x4xi32> to vector<128x1xi32>
    %16 = vector.broadcast %15 : vector<128x1xi32> to vector<128x128xi32>
    %17 = arith.cmpi eq, %16, %1 : vector<128x128xi32>
    %18 = arith.extui %17 : vector<128x128xi1> to vector<128x128xi32>
    %19 = arith.sitofp %18 : vector<128x128xi32> to vector<128x128xf32>
    %20 = arith.addf %14, %19 : vector<128x128xf32>
    %21 = vector.extract_strided_slice %0 {offsets = [0, 3], sizes = [128, 1], strides = [1, 1]} : vector<128x4xi32> to vector<128x1xi32>
    %22 = vector.broadcast %21 : vector<128x1xi32> to vector<128x128xi32>
    %23 = arith.cmpi eq, %22, %1 : vector<128x128xi32>
    %24 = arith.extui %23 : vector<128x128xi1> to vector<128x128xi32>
    %25 = arith.sitofp %24 : vector<128x128xi32> to vector<128x128xf32>
    %26 = arith.addf %20, %25 : vector<128x128xf32>
    %27 = arith.truncf %26 : vector<128x128xf32> to vector<128x128xbf16>
    %c0_1 = arith.constant 0 : index
    %c0_2 = arith.constant 0 : index
    %28 = vector.load %arg2[%c0_1, %c0_2] : memref<128x128xf32, #tpu.memory_space<vmem>>, vector<128x128xf32>
    %29 = arith.truncf %28 : vector<128x128xf32> to vector<128x128xbf16>
    %cst_3 = arith.constant dense<0.000000e+00> : vector<128x128xf32>
    %30 = tpu.matmul %27, %29, %cst_3 {dimension_numbers = #tpu.dot_dimension_numbers<[1], [0], [0], [1], [0, 0, 1, 1], [], []>} : vector<128x128xbf16>, vector<128x128xbf16>, vector<128x128xf32> -> vector<128x128xf32>
    %cst_4 = arith.constant 2.500000e-01 : f32
    %31 = vector.broadcast %cst_4 : f32 to vector<128x128xf32>
    %32 = arith.mulf %30, %31 : vector<128x128xf32>
    %33 = arith.truncf %32 : vector<128x128xf32> to vector<128x128xbf16>
    %c0_5 = arith.constant 0 : index
    %c0_6 = arith.constant 0 : index
    %34 = vector.load %arg3[%c0_5, %c0_6] : memref<128x128xbf16, #tpu.memory_space<vmem>>, vector<128x128xbf16>
    %cst_7 = arith.constant dense<0.000000e+00> : vector<128x128xf32>
    %35 = tpu.matmul %33, %34, %cst_7 {dimension_numbers = #tpu.dot_dimension_numbers<[1], [0], [0], [1], [0, 0, 1, 1], [], []>} : vector<128x128xbf16>, vector<128x128xbf16>, vector<128x128xf32> -> vector<128x128xf32>
    %cst_8 = arith.constant 0.000000e+00 : f32
    %36 = vector.broadcast %cst_8 : f32 to vector<128x128xf32>
    %37 = arith.maximumf %35, %36 : vector<128x128xf32>
    %38 = arith.truncf %37 : vector<128x128xf32> to vector<128x128xbf16>
    %cst_9 = arith.constant dense<0.000000e+00> : vector<128x128xf32>
    %39 = tpu.matmul %27, %38, %cst_9 {dimension_numbers = #tpu.dot_dimension_numbers<[1], [0], [0], [1], [0, 0, 1, 1], [], []>} : vector<128x128xbf16>, vector<128x128xbf16>, vector<128x128xf32> -> vector<128x128xf32>
    %cst_10 = arith.constant 2.500000e-01 : f32
    %40 = vector.broadcast %cst_10 : f32 to vector<128x128xf32>
    %41 = arith.mulf %39, %40 : vector<128x128xf32>
    %42 = arith.truncf %41 : vector<128x128xf32> to vector<128x128xbf16>
    %c0_11 = arith.constant 0 : index
    %c0_12 = arith.constant 0 : index
    %43 = vector.load %arg4[%c0_11, %c0_12] : memref<128x128xbf16, #tpu.memory_space<vmem>>, vector<128x128xbf16>
    %cst_13 = arith.constant dense<0.000000e+00> : vector<128x128xf32>
    %44 = tpu.matmul %42, %43, %cst_13 {dimension_numbers = #tpu.dot_dimension_numbers<[1], [0], [0], [1], [0, 0, 1, 1], [], []>} : vector<128x128xbf16>, vector<128x128xbf16>, vector<128x128xf32> -> vector<128x128xf32>
    %cst_14 = arith.constant 0.000000e+00 : f32
    %45 = vector.broadcast %cst_14 : f32 to vector<128x128xf32>
    %46 = arith.maximumf %44, %45 : vector<128x128xf32>
    %47 = arith.truncf %46 : vector<128x128xf32> to vector<128x128xbf16>
    %c0_15 = arith.constant 0 : index
    %c0_16 = arith.constant 0 : index
    %48 = vector.load %arg5[%c0_15, %c0_16] : memref<128x128xbf16, #tpu.memory_space<vmem>>, vector<128x128xbf16>
    %cst_17 = arith.constant dense<0.000000e+00> : vector<128x128xf32>
    %49 = tpu.matmul %47, %48, %cst_17 {dimension_numbers = #tpu.dot_dimension_numbers<[1], [0], [0], [1], [0, 0, 1, 1], [], []>} : vector<128x128xbf16>, vector<128x128xbf16>, vector<128x128xf32> -> vector<128x128xf32>
    %c0_18 = arith.constant 0 : index
    %c0_19 = arith.constant 0 : index
    %50 = vector.load %arg6[%c0_18, %c0_19] : memref<1x128xf32, #tpu.memory_space<vmem>>, vector<1x128xf32>
    %51 = vector.broadcast %50 : vector<1x128xf32> to vector<128x128xf32>
    %52 = arith.addf %49, %51 : vector<128x128xf32>
    %cst_20 = arith.constant dense<0xFF800000> : vector<128xf32>
    %53 = vector.multi_reduction <maximumf>, %52, %cst_20 [1] : vector<128x128xf32> to vector<128xf32>
    %54 = vector.shape_cast %53 : vector<128xf32> to vector<128x1xf32>
    %55 = vector.broadcast %54 : vector<128x1xf32> to vector<128x128xf32>
    %56 = arith.subf %52, %55 : vector<128x128xf32>
    %57 = math.exp %56 : vector<128x128xf32>
    %cst_21 = arith.constant dense<0.000000e+00> : vector<128xf32>
    %58 = vector.multi_reduction <add>, %57, %cst_21 [1] : vector<128x128xf32> to vector<128xf32>
    %59 = vector.shape_cast %58 : vector<128xf32> to vector<128x1xf32>
    %60 = math.log %59 : vector<128x1xf32>
    %61 = arith.addf %60, %54 : vector<128x1xf32>
    %62 = vector.broadcast %61 : vector<128x1xf32> to vector<128x128xf32>
    %63 = arith.subf %52, %62 : vector<128x128xf32>
    %c0_22 = arith.constant 0 : index
    %c0_23 = arith.constant 0 : index
    %64 = vector.load %arg7[%c0_22, %c0_23] : memref<128x128xf32, #tpu.memory_space<vmem>>, vector<128x128xf32>
    tpu.vector_store %arg7[%c0_22, %c0_23], %63 {strides = array<i32>} : memref<128x128xf32, #tpu.memory_space<vmem>>, vector<128x128xf32>,
    return
  }
  func.func @transform_0(%arg0: i32) -> (i32, i32) {
    %c0_i32 = arith.constant 0 : i32
    %c0_i32_0 = arith.constant 0 : i32
    %c0_i32_1 = arith.constant 0 : i32
    return %c0_i32, %c0_i32_0 : i32, i32
  }
  func.func @transform_1(%arg0: i32) -> (i32, i32) {
    %c0_i32 = arith.constant 0 : i32
    %c0_i32_0 = arith.constant 0 : i32
    %c0_i32_1 = arith.constant 0 : i32
    return %c0_i32, %c0_i32_0 : i32, i32
  }
  func.func @transform_2(%arg0: i32) -> (i32, i32) {
    %c0_i32 = arith.constant 0 : i32
    %c0_i32_0 = arith.constant 0 : i32
    %c0_i32_1 = arith.constant 0 : i32
    return %c0_i32, %c0_i32_0 : i32, i32
  }
  func.func @transform_3(%arg0: i32) -> (i32, i32) {
    %c0_i32 = arith.constant 0 : i32
    %c0_i32_0 = arith.constant 0 : i32
    %c0_i32_1 = arith.constant 0 : i32
    return %c0_i32, %c0_i32_0 : i32, i32
  }
  func.func @transform_4(%arg0: i32) -> (i32, i32) {
    %c0_i32 = arith.constant 0 : i32
    %c0_i32_0 = arith.constant 0 : i32
    %c0_i32_1 = arith.constant 0 : i32
    return %c0_i32, %c0_i32_0 : i32, i32
  }
  func.func @transform_5(%arg0: i32) -> (i32, i32) {
    %c0_i32 = arith.constant 0 : i32
    %c0_i32_0 = arith.constant 0 : i32
    %c0_i32_1 = arith.constant 0 : i32
    return %c0_i32, %c0_i32_0 : i32, i32
  }
  func.func @transform_6(%arg0: i32) -> (i32, i32) {
    %c0_i32 = arith.constant 0 : i32
    %c0_i32_0 = arith.constant 0 : i32
    %c0_i32_1 = arith.constant 0 : i32
    return %c0_i32, %c0_i32_0 : i32, i32
  }
}

</mosaic_0001>

<bundles_post_ra>
// kernel: tpu_custom_call.1
= control target key start
LH: loop header
LB: loop body
LE: loop exit
PB: predicated region body
PF: predicated region fallthrough
CT: control target
= control target key end

     0   :  { %11 = vsyncpa [#allocation3], 0  ;;  %s2826_s0 = inlined_call_operand.vmem [shape: s32[128,4], index: 0, kind: input, shape index: {}]   ;;  %s2827_s1 = inlined_call_operand.vmem [shape: f32[128,128], index: 1, kind: input, shape index: {}]   ;;  %s2828_s2 = inlined_call_operand.hbm [shape: bf16[128,128], index: 2, kind: input, shape index: {}]   ;;  %s2829_s3 = inlined_call_operand.hbm [shape: bf16[128,128], index: 3, kind: input, shape index: {}]   ;;  %s2830_s4 = inlined_call_operand.hbm [shape: bf16[128,128], index: 4, kind: input, shape index: {}]   ;;  %s2831_s5 = inlined_call_operand.vmem [shape: f32[1,128], index: 5, kind: input, shape index: {}]   ;;  %s2832_s6 = inlined_call_operand.hbm [shape: f32[128,128], index: 6, kind: output, shape index: {}]  }
   0x1   :  { %12 = vsyncpa [#allocation6], 0 }
   0x2   :  { %13 = vsyncpa [#allocation4], 0  ;;  %s2121_s21 = smov [#allocation5]   ;;  %s2122_s23 = smov [#allocation2]  }
   0x3   :  { %s35_s22 = sshll.u32 %s2121_s21, 4  ;;  %s23_s24 = sshll.u32 %s2122_s23, 4  ;;  %s36_s22 = int_to_ptr.vmem [resolvable:$true] %s35_s22  ;;  %s2169_s24 = int_to_ptr.vmem [resolvable:$true] %s23_s24 }
   0x4   :  { %s2027_s27 = scalar_lea.hbm %s2829_s3, 1024 }
   0x5   :  { %p2028_p0 = scmp.ne.s32.totalorder %s2829_s3, %s2027_s27  ;;  %p2031_p1 = scmp.lt.u32.totalorder %s2027_s27, %s2829_s3 }
   0x7   :  { %p2033_p2 = pnand %p2031_p1, %p2028_p0 }
   0x9   :  { %2036 = shalt.err (!%p2033_p2)
}
   0xa   :  { %s2037_s8 = scalar_lea.vmem %s36_s22, 1024  ;;  %p2042_p4 = scmp.lt.s32.totalorder %s36_s22, %s36_s22 }
   0xb   :  { %p2038_p3 = scmp.ne.s32.totalorder %s36_s22, %s2037_s8  ;;  %p2043_p5 = scmp.lt.s32.totalorder %s2037_s8, %s2037_s8 }
   0xd   :  { %p2044_p6 = por %p2043_p5, %p2042_p4 }
   0xf   :  { %p2045_p7 = pnand %p2044_p6, %p2038_p3 }
  0x11   :  { %2048 = shalt.err (!%p2045_p7)
}
  0x12   :  { %s2123_s9 = smov 64   ;;  %s2124_s10 = smov 4  }
  0x13   :  { %41 = dma.hbm_to_vmem [thread:$0]  %s2829_s3, 1024, %s36_s22, [#allocation6], %s2123_s9, %s2123_s9, %s2124_s10  }
  0x14   :  { %s2049_s15 = scalar_lea.hbm %s2828_s2, 1024 }
  0x15   :  { %p2050_p8 = scmp.ne.s32.totalorder %s2828_s2, %s2049_s15  ;;  %p2053_p9 = scmp.lt.u32.totalorder %s2049_s15, %s2828_s2 }
  0x17   :  { %p2055_p10 = pnand %p2053_p9, %p2050_p8 }
  0x19   :  { %2058 = shalt.err (!%p2055_p10)
}
  0x1a   :  { %s2059_s20 = scalar_lea.vmem %s2169_s24, 1024  ;;  %p2064_p12 = scmp.lt.s32.totalorder %s2169_s24, %s2169_s24 }
  0x1b   :  { %p2060_p11 = scmp.ne.s32.totalorder %s2169_s24, %s2059_s20  ;;  %p2065_p13 = scmp.lt.s32.totalorder %s2059_s20, %s2059_s20 }
  0x1d   :  { %p2066_p0 = por %p2065_p13, %p2064_p12 }
  0x1f   :  { %p2067_p1 = pnand %p2066_p0, %p2060_p11 }
  0x21   :  { %2070 = shalt.err (!%p2067_p1)
}
  0x22   :  { %29 = dma.hbm_to_vmem [thread:$0]  %s2828_s2, 1024, %s2169_s24, [#allocation3], %s2123_s9, %s2123_s9, %s2124_s10  }
  0x23   :  { %s2125_s22 = smov [#allocation7]   ;;  %s2071_s27 = scalar_lea.hbm %s2830_s4, 1024 }
  0x24   :  { %s47_s23 = sshll.u32 %s2125_s22, 4  ;;  %p2072_p2 = scmp.ne.s32.totalorder %s2830_s4, %s2071_s27  ;;  %s48_s23 = int_to_ptr.vmem [resolvable:$true] %s47_s23 }
  0x25   :  { %p2075_p3 = scmp.lt.u32.totalorder %s2071_s27, %s2830_s4 }
  0x27   :  { %p2077_p4 = pnand %p2075_p3, %p2072_p2 }
  0x29   :  { %2080 = shalt.err (!%p2077_p4)
}
  0x2a   :  { %s2081_s8 = scalar_lea.vmem %s48_s23, 1024  ;;  %p2086_p6 = scmp.lt.s32.totalorder %s48_s23, %s48_s23 }
  0x2b   :  { %p2082_p5 = scmp.ne.s32.totalorder %s48_s23, %s2081_s8  ;;  %p2087_p7 = scmp.lt.s32.totalorder %s2081_s8, %s2081_s8 }
  0x2d   :  { %p2088_p8 = por %p2087_p7, %p2086_p6 }
  0x2f   :  { %p2089_p9 = pnand %p2088_p8, %p2082_p5 }
  0x31   :  { %2092 = shalt.err (!%p2089_p9)
}
  0x32   :  { %53 = dma.hbm_to_vmem [thread:$0]  %s2830_s4, 1024, %s48_s23, [#allocation6], %s2123_s9, %s2123_s9, %s2124_s10  }
  0x33   :  { %2115 = dma.done.wait [#allocation3], 1024  }
  0x34   :  { %2116 = vsyncadd [#allocation3], 4294966272 }
  0x35   :  { %2117 = dma.done.wait [#allocation6], 2048  }
  0x36   :  { %2118 = vsyncadd [#allocation6], 4294965248  ;;  %v2126_v0 = vmov 1   ;;  %v2127_v1 = vmov 0   ;;  %v2226_v2 = vld [vmem:[%s2826_s0] sm:$0xff]  ;;  %v67_v3 = vld [vmem:[%s2826_s0 + $0x8] sm:$0xff]  ;;  %v82_v61 = vlaneseq }
  0x37   :  { %1913 = vset.pattern.permute.xlu1 %v2126_v0  ;;  %1912 = vset.pattern.permute.xlu0 %v2127_v1  ;;  %v68_v4 = vld [vmem:[%s2826_s0 + $0x10] sm:$0xff]  ;;  %v2239_v5 = vld [vmem:[%s2826_s0 + $0x18] sm:$0xff]  ;;  %v2244_v6 = vld [vmem:[%s2826_s0 + $0x28] sm:$0xff]  ;;  %v2128_v9 = vmov 2   ;;  %v2129_v13 = vmov 3  }
  0x38   :  { %197 = vperm.xlu1 %1913, %v2226_v2   ;;  %85 = vperm.xlu0 %1912, %v2226_v2   ;;  %v2251_v7 = vld [vmem:[%s2826_s0 + $0x30] sm:$0xff]  ;;  %v2260_v8 = vld [vmem:[%s2826_s0 + $0x48] sm:$0xff]  ;;  %v2289_v14 = vld [vmem:[%s2826_s0 + $0x20] sm:$0xff] }
  0x39   :  { %v2268_v10 = vld [vmem:[%s2826_s0 + $0x50] sm:$0xff]  ;;  %v2274_v11 = vld [vmem:[%s2826_s0 + $0x68] sm:$0xff]  ;;  %v540_v15 = vld [vmem:[%s2827_s1] sm:$0xff] }
  0x3a   :  { %v2281_v12 = vld [vmem:[%s2826_s0 + $0x70] sm:$0xff]  ;;  %v541_v16 = vld [vmem:[%s2827_s1 + $0x8] sm:$0xff]  ;;  %v543_v19 = vld [vmem:[%s2827_s1 + $0x18] sm:$0xff] }
  0x3b   :  { %v556_v17 = vpack.c.bf16 %v541_v16, %v540_v15  ;;  %v542_v18 = vld [vmem:[%s2827_s1 + $0x10] sm:$0xff]  ;;  %v73_v21 = vld [vmem:[%s2826_s0 + $0x38] sm:$0xff]  ;;  %v544_v22 = vld [vmem:[%s2827_s1 + $0x20] sm:$0xff] }
  0x3c   :  { %200 = vperm.xlu1 %1913, %v67_v3   ;;  %88 = vperm.xlu0 %1912, %v67_v3   ;;  %v557_v20 = vpack.c.bf16 %v543_v19, %v542_v18  ;;  %v545_v23 = vld [vmem:[%s2827_s1 + $0x28] sm:$0xff]  ;;  %v546_v25 = vld [vmem:[%s2827_s1 + $0x30] sm:$0xff]  ;;  %v547_v26 = vld [vmem:[%s2827_s1 + $0x38] sm:$0xff] }
  0x3d   :  { %1723 = vmatprep.subr.bf16.mxu0 %v556_v17  ;;  %v558_v24 = vpack.c.bf16 %v545_v23, %v544_v22  ;;  %v559_v27 = vpack.c.bf16 %v547_v26, %v546_v25  ;;  %v548_v28 = vld [vmem:[%s2827_s1 + $0x40] sm:$0xff]  ;;  %v549_v29 = vld [vmem:[%s2827_s1 + $0x48] sm:$0xff]  ;;  %v550_v31 = vld [vmem:[%s2827_s1 + $0x50] sm:$0xff] }
  0x3e   :  { %1724 = vmatpush3.bf16.msra.mxu0 %v556_v17  ;;  %v560_v30 = vpack.c.bf16 %v549_v29, %v548_v28  ;;  %v551_v32 = vld [vmem:[%s2827_s1 + $0x58] sm:$0xff]  ;;  %v552_v34 = vld [vmem:[%s2827_s1 + $0x60] sm:$0xff]  ;;  %v553_v35 = vld [vmem:[%s2827_s1 + $0x68] sm:$0xff] }
  0x3f   :  { %1725 = vmatprep.subr.bf16.mxu0 %v557_v20  ;;  %v561_v33 = vpack.c.bf16 %v551_v32, %v550_v31  ;;  %v562_v36 = vpack.c.bf16 %v553_v35, %v552_v34  ;;  %v554_v37 = vld [vmem:[%s2827_s1 + $0x70] sm:$0xff]  ;;  %v555_v38 = vld [vmem:[%s2827_s1 + $0x78] sm:$0xff]  ;;  %v74_v40 = vld [vmem:[%s2826_s0 + $0x40] sm:$0xff] }
  0x40   :  { %1914 = vset.pattern.permute.xlu1 %v2127_v1  ;;  %91 = vperm.xlu0 %1912, %v68_v4   ;;  %v563_v39 = vpack.c.bf16 %v555_v38, %v554_v37  ;;  %v77_v41 = vld [vmem:[%s2826_s0 + $0x58] sm:$0xff]  ;;  %v78_v42 = vld [vmem:[%s2826_s0 + $0x60] sm:$0xff]  ;;  %v1940_v17 = vld [vmem:[#allocation2 + $0x8] sm:$0xff]  }
  0x41   :  { %94 = vperm.xlu1 %1914, %v2239_v5   ;;  %v81_v43 = vld [vmem:[%s2826_s0 + $0x78] sm:$0xff]  ;;  %v1939_v16 = vld [vmem:[#allocation2] sm:$0xff]   ;;  %v1941_v19 = vld [vmem:[#allocation2 + $0x10] sm:$0xff]  }
  0x42   :  { %1726 = vmatpush3.bf16.msra.mxu0 %v557_v20  ;;  %1755 = vmatprep.subr.bf16.mxu1 %v1939_v16  ;;  %v1942_v22 = vld [vmem:[#allocation2 + $0x18] sm:$0xff]   ;;  %v1943_v32 = vld [vmem:[#allocation2 + $0x20] sm:$0xff]  }
  0x43   :  { %1727 = vmatprep.subr.bf16.mxu0 %v558_v24  ;;  %1756 = vmatpush3.bf16.msra.mxu1 %v1939_v16 }
  0x44   :  { %100 = vperm.xlu0 %1912, %v2244_v6   ;;  %1757 = vmatprep.subr.bf16.mxu1 %v1940_v17 }
  0x45   :  { %1915 = vset.pattern.permute.xlu1 %v2126_v0 }
  0x46   :  { %206 = vperm.xlu1 %1915, %v2239_v5   ;;  %1728 = vmatpush3.bf16.msra.mxu0 %v558_v24 }
  0x47   :  { %1729 = vmatprep.subr.bf16.mxu0 %v559_v27  ;;  %1758 = vmatpush3.bf16.msra.mxu1 %v1940_v17 }
  0x48   :  { %103 = vperm.xlu0 %1912, %v2251_v7   ;;  %1759 = vmatprep.subr.bf16.mxu1 %v1941_v19 }
  0x4a   :  { %1916 = vset.pattern.permute.xlu1 %v2128_v9  ;;  %1730 = vmatpush3.bf16.msra.mxu0 %v559_v27 }
  0x4b   :  { %309 = vperm.xlu1 %1916, %v2226_v2   ;;  %1731 = vmatprep.subr.bf16.mxu0 %v560_v30 }
  0x4c   :  { %112 = vperm.xlu0 %1912, %v2260_v8   ;;  %1760 = vmatpush3.bf16.msra.mxu1 %v1941_v19 }
  0x4d   :  { %1761 = vmatprep.subr.bf16.mxu1 %v1942_v22 }
  0x4e   :  { %1732 = vmatpush3.bf16.msra.mxu0 %v560_v30 }
  0x4f   :  { %315 = vperm.xlu1 %1916, %v68_v4   ;;  %1733 = vmatprep.subr.bf16.mxu0 %v561_v33 }
  0x50   :  { %115 = vperm.xlu0 %1912, %v2268_v10   ;;  %1762 = vmatpush3.bf16.msra.mxu1 %v1942_v22 }
  0x51   :  { %1763 = vmatprep.subr.bf16.mxu1 %v1943_v32 }
  0x52   :  { %1734 = vmatpush3.bf16.msra.mxu0 %v561_v33 }
  0x53   :  { %318 = vperm.xlu1 %1916, %v2239_v5   ;;  %1735 = vmatprep.subr.bf16.mxu0 %v562_v36 }
  0x54   :  { %124 = vperm.xlu0 %1912, %v2274_v11   ;;  %1764 = vmatpush3.bf16.msra.mxu1 %v1943_v32 }
  0x56   :  { %1736 = vmatpush3.bf16.msra.mxu0 %v562_v36 }
  0x57   :  { %1917 = vset.pattern.permute.xlu1 %v2129_v13  ;;  %1737 = vmatprep.subr.bf16.mxu0 %v563_v39 }
  0x58   :  { %424 = vperm.xlu1 %1917, %v67_v3   ;;  %127 = vperm.xlu0 %1912, %v2281_v12  }
  0x5a   :  { %1738 = vmatpush3.bf16.msra.mxu0 %v563_v39 }
  0x5c   :  { %427 = vperm.xlu1 %1917, %v68_v4   ;;  %1932 = vset.pattern.permute.xlu0 %v2126_v0 }
  0x5d   :  { %203 = vperm.xlu0 %1932, %v68_v4  }
  0x60   :  { %1918 = vset.pattern.permute.xlu1 %v2127_v1 }
  0x61   :  { %97 = vperm.xlu1 %1918, %v2289_v14   ;;  %215 = vperm.xlu0 %1932, %v2251_v7  }
  0x65   :  { %1919 = vset.pattern.permute.xlu1 %v2126_v0  ;;  %227 = vperm.xlu0 %1932, %v2268_v10  }
  0x66   :  { %209 = vperm.xlu1 %1919, %v2289_v14  }
  0x69   :  { %239 = vperm.xlu0 %1932, %v2281_v12  }
  0x6a   :  { %212 = vperm.xlu1 %1919, %v2244_v6  }
  0x6d   :  { %1934 = vset.pattern.permute.xlu0 %v2128_v9 }
  0x6e   :  { %1920 = vset.pattern.permute.xlu1 %v2127_v1  ;;  %312 = vperm.xlu0 %1934, %v67_v3   ;;  %v2130_v3 = vmov 0.0  }
  0x6f   :  { %106 = vperm.xlu1 %1920, %v73_v21  }
  0x72   :  { %324 = vperm.xlu0 %1934, %v2244_v6  }
  0x73   :  { %1921 = vset.pattern.permute.xlu1 %v2126_v0 }
  0x74   :  { %218 = vperm.xlu1 %1921, %v73_v21  }
  0x76   :  { %336 = vperm.xlu0 %1934, %v2260_v8  }
  0x78   :  { %1922 = vset.pattern.permute.xlu1 %v2128_v9 }
  0x79   :  { %321 = vperm.xlu1 %1922, %v2289_v14  }
  0x7a   :  { %348 = vperm.xlu0 %1934, %v2274_v11  }
  0x7d   :  { %327 = vperm.xlu1 %1922, %v2251_v7  }
  0x7e   :  { %1937 = vset.pattern.permute.xlu0 %v2129_v13 }
  0x7f   :  { %421 = vperm.xlu0 %1937, %v2226_v2  }
  0x81   :  { %330 = vperm.xlu1 %1922, %v73_v21  }
  0x83   :  { %430 = vperm.xlu0 %1937, %v2239_v5  }
  0x85   :  { %1923 = vset.pattern.permute.xlu1 %v2129_v13 }
  0x86   :  { %436 = vperm.xlu1 %1923, %v2244_v6  }
  0x87   :  { %433 = vperm.xlu0 %1937, %v2289_v14  }
  0x8a   :  { %439 = vperm.xlu1 %1923, %v2251_v7  }
  0x8b   :  { %442 = vperm.xlu0 %1937, %v73_v21  }
  0x8e   :  { %1924 = vset.pattern.permute.xlu1 %v2127_v1 }
  0x8f   :  { %109 = vperm.xlu1 %1924, %v74_v40   ;;  %445 = vperm.xlu0 %1937, %v74_v40  }
  0x93   :  { %1925 = vset.pattern.permute.xlu1 %v2126_v0  ;;  %454 = vperm.xlu0 %1937, %v77_v41  }
  0x94   :  { %221 = vperm.xlu1 %1925, %v74_v40  }
  0x97   :  { %457 = vperm.xlu0 %1937, %v78_v42  }
  0x98   :  { %224 = vperm.xlu1 %1925, %v2260_v8  }
  0x9b   :  { %466 = vperm.xlu0 %1937, %v81_v43  }
  0x9c   :  { %1926 = vset.pattern.permute.xlu1 %v2127_v1 }
  0x9d   :  { %118 = vperm.xlu1 %1926, %v77_v41  }
  0xa1   :  { %1927 = vset.pattern.permute.xlu1 %v2126_v0 }
  0xa2   :  { %230 = vperm.xlu1 %1927, %v77_v41  }
  0xa6   :  { %1928 = vset.pattern.permute.xlu1 %v2128_v9 }
  0xa7   :  { %333 = vperm.xlu1 %1928, %v74_v40  }
  0xab   :  { %339 = vperm.xlu1 %1928, %v2268_v10  }
  0xaf   :  { %342 = vperm.xlu1 %1928, %v77_v41  }
  0xb3   :  { %1929 = vset.pattern.permute.xlu1 %v2129_v13 }
  0xb4   :  { %448 = vperm.xlu1 %1929, %v2260_v8  }
  0xb7   :  { %v2387_v44 = vpop.permute.xlu1 %197  ;;  %v2389_v45 = vpop.permute.xlu0 %85 }
  0xb8   :  { %451 = vperm.xlu1 %1929, %v2268_v10  }
  0xbb   :  { %v2392_v46 = vpop.permute.xlu1 %200  ;;  %v2394_v47 = vpop.permute.xlu0 %88 }
  0xbc   :  { %1930 = vset.pattern.permute.xlu1 %v2127_v1 }
  0xbd   :  { %121 = vperm.xlu1 %1930, %v78_v42  }
  0xbf   :  { %v2397_v48 = vpop.permute.xlu0 %91 }
  0xc0   :  { %v2399_v49 = vpop.permute.xlu1 %94 }
  0xc1   :  { %1931 = vset.pattern.permute.xlu1 %v2126_v0 }
  0xc2   :  { %233 = vperm.xlu1 %1931, %v78_v42  }
  0xc3   :  { %v2402_v50 = vpop.permute.xlu0 %100 }
  0xc5   :  { %v2404_v51 = vpop.permute.xlu1 %206 }
  0xc6   :  { %236 = vperm.xlu1 %1931, %v2274_v11  }
  0xc7   :  { %v2407_v52 = vpop.permute.xlu0 %103 }
  0xca   :  { %1933 = vset.pattern.permute.xlu1 %v2127_v1  ;;  %v2410_v53 = vpop.permute.xlu1 %309 }
  0xcb   :  { %130 = vperm.xlu1 %1933, %v81_v43   ;;  %v2412_v54 = vpop.permute.xlu0 %112 }
  0xce   :  { %v2414_v55 = vpop.permute.xlu1 %315 }
  0xcf   :  { %1935 = vset.pattern.permute.xlu1 %v2126_v0  ;;  %v116_v56 = vpop.permute.xlu0 %115  ;;  %v2427_v0 = vand.u32 127, %v82_v61 }
  0xd0   :  { %242 = vperm.xlu1 %1935, %v81_v43  }
  0xd1   :  { %vm142_vm0 = vcmp.eq.s32.totalorder %v116_v56, %v2427_v0  ;;  %vm244_vm4 = vcmp.eq.s32.totalorder %v2387_v44, %v2427_v0  ;;  %vm132_vm5 = vcmp.eq.s32.totalorder %v2389_v45, %v2427_v0  ;;  %vm245_vm6 = vcmp.eq.s32.totalorder %v2392_v46, %v2427_v0 }
  0xd2   :  { %v2417_v57 = vpop.permute.xlu1 %318  ;;  %v1564_v4 = vsel %vm142_vm0, 1.0, %v2130_v3  ;;  %vm133_vm7 = vcmp.eq.s32.totalorder %v2394_v47, %v2427_v0  ;;  %v1570_v23 = vsel %vm244_vm4, 1.0, %v2130_v3  ;;  %vm134_vm8 = vcmp.eq.s32.totalorder %v2397_v48, %v2427_v0  ;;  %v1944_v47 = vld [vmem:[#allocation2 + $0x28] sm:$0xff]  }
  0xd3   :  { %v2419_v58 = vpop.permute.xlu0 %124  ;;  %vm247_vm9 = vcmp.eq.s32.totalorder %v2404_v51, %v2427_v0  ;;  %v1554_v24 = vsel %vm132_vm5, 1.0, %v2130_v3  ;;  %v1571_v25 = vsel %vm245_vm6, 1.0, %v2130_v3  ;;  %vm356_vm11 = vcmp.eq.s32.totalorder %v2410_v53, %v2427_v0  ;;  %1765 = vmatprep.subr.bf16.mxu1 %v1944_v47 }
  0xd4   :  { %1936 = vset.pattern.permute.xlu1 %v2128_v9  ;;  %v1555_v26 = vsel %vm133_vm7, 1.0, %v2130_v3  ;;  %vm135_vm13 = vcmp.eq.s32.totalorder %v2399_v49, %v2427_v0  ;;  %vm137_vm14 = vcmp.eq.s32.totalorder %v2402_v50, %v2427_v0  ;;  %vm359_vm15 = vcmp.eq.s32.totalorder %v2417_v57, %v2427_v0  ;;  %1766 = vmatpush3.bf16.msra.mxu1 %v1944_v47 }
  0xd5   :  { %345 = vperm.xlu1 %1936, %v78_v42   ;;  %v1556_v28 = vsel %vm134_vm8, 1.0, %v2130_v3  ;;  %v1573_v29 = vsel %vm247_vm9, 1.0, %v2130_v3  ;;  %vm138_vm0 = vcmp.eq.s32.totalorder %v2407_v52, %v2427_v0  ;;  %v292_v33 = vadd.f32 %v1570_v23, %v1554_v24 }
  0xd6   :  { %v1586_v34 = vsel %vm356_vm11, 1.0, %v2130_v3  ;;  %v293_v36 = vadd.f32 %v1571_v25, %v1555_v26  ;;  %v1557_v37 = vsel %vm135_vm13, 1.0, %v2130_v3  ;;  %v1559_v38 = vsel %vm137_vm14, 1.0, %v2130_v3 }
  0xd7   :  { %v2422_v59 = vpop.permute.xlu1 %424  ;;  %v128_v60 = vpop.permute.xlu0 %127  ;;  %v1589_v39 = vsel %vm359_vm15, 1.0, %v2130_v3  ;;  %v295_v40 = vadd.f32 %v1573_v29, %v1557_v37  ;;  %v1560_v41 = vsel %vm138_vm0, 1.0, %v2130_v3  ;;  %v404_v44 = vadd.f32 %v1586_v34, %v292_v33 }
  0xd8   :  { %vm146_vm1 = vcmp.eq.s32.totalorder %v128_v60, %v2427_v0 }
  0xd9   :  { %351 = vperm.xlu1 %1936, %v2281_v12   ;;  %v1568_v9 = vsel %vm146_vm1, 1.0, %v2130_v3  ;;  %vm358_vm1 = vcmp.eq.s32.totalorder %v2414_v55, %v2427_v0  ;;  %v407_v48 = vadd.f32 %v1589_v39, %v295_v40 }
  0xda   :  { %v1588_v45 = vsel %vm358_vm1, 1.0, %v2130_v3 }
  0xdb   :  { %v2425_v62 = vpop.permute.xlu1 %427 }
  0xdc   :  { %v204_v63 = vpop.permute.xlu0 %203  ;;  %vm470_vm4 = vcmp.eq.s32.totalorder %v2425_v62, %v2427_v0 }
  0xdd   :  { %354 = vperm.xlu1 %1936, %v81_v43   ;;  %vm246_vm10 = vcmp.eq.s32.totalorder %v204_v63, %v2427_v0  ;;  %v1604_v61 = vsel %vm470_vm4, 1.0, %v2130_v3 }
  0xde   :  { %v1572_v30 = vsel %vm246_vm10, 1.0, %v2130_v3 }
  0xdf   :  { %v294_v42 = vadd.f32 %v1572_v30, %v1556_v28 }
  0xe0   :  { %v2429_v1 = vpop.permute.xlu1 %97  ;;  %v2431_v2 = vpop.permute.xlu0 %215 }
  0xe1   :  { %1938 = vset.pattern.permute.xlu1 %v2129_v13  ;;  %vm136_vm7 = vcmp.eq.s32.totalorder %v2429_v1, %v2427_v0  ;;  %v406_v52 = vadd.f32 %v1588_v45, %v294_v42 }
  0xe2   :  { %460 = vperm.xlu1 %1938, %v2274_v11   ;;  %v1558_v63 = vsel %vm136_vm7, 1.0, %v2130_v3 }
  0xe4   :  { %v228_v5 = vpop.permute.xlu0 %227 }
  0xe5   :  { %v2438_v6 = vpop.permute.xlu1 %209  ;;  %vm254_vm2 = vcmp.eq.s32.totalorder %v228_v5, %v2427_v0 }
  0xe6   :  { %v1580_v7 = vsel %vm254_vm2, 1.0, %v2130_v3  ;;  %463 = vperm.xlu1 %1938, %v2281_v12   ;;  %vm250_vm2 = vcmp.eq.s32.totalorder %v2431_v2, %v2427_v0  ;;  %vm248_vm5 = vcmp.eq.s32.totalorder %v2438_v6, %v2427_v0 }
  0xe7   :  { %v2443_v8 = vadd.f32 %v1580_v7, %v1564_v4  ;;  %v1576_v50 = vsel %vm250_vm2, 1.0, %v2130_v3  ;;  %v1574_v56 = vsel %vm248_vm5, 1.0, %v2130_v3 }
  0xe8   :  { %v240_v10 = vpop.permute.xlu0 %239  ;;  %v298_v2 = vadd.f32 %v1576_v50, %v1560_v41  ;;  %v296_v7 = vadd.f32 %v1574_v56, %v1558_v63 }
  0xe9   :  { %v2446_v11 = vpop.permute.xlu1 %212  ;;  %vm258_vm3 = vcmp.eq.s32.totalorder %v240_v10, %v2427_v0 }
  0xea   :  { %v1584_v13 = vsel %vm258_vm3, 1.0, %v2130_v3  ;;  %vm469_vm3 = vcmp.eq.s32.totalorder %v2422_v59, %v2427_v0  ;;  %vm249_vm6 = vcmp.eq.s32.totalorder %v2446_v11, %v2427_v0 }
  0xeb   :  { %v2450_v14 = vadd.f32 %v1584_v13, %v1568_v9  ;;  %v1603_v51 = vsel %vm469_vm3, 1.0, %v2130_v3  ;;  %v1575_v57 = vsel %vm249_vm6, 1.0, %v2130_v3  ;;  %v518_v13 = vadd.f32 %v1604_v61, %v406_v52 }
  0xec   :  { %v297_v9 = vadd.f32 %v1575_v57, %v1559_v38  ;;  %vm141_vm6 = vcmp.eq.s32.totalorder %v2412_v54, %v2427_v0 }
  0xed   :  { %v313_v15 = vpop.permute.xlu0 %312  ;;  %v1563_v50 = vsel %vm141_vm6, 1.0, %v2130_v3 }
  0xee   :  { %v2452_v18 = vpop.permute.xlu1 %106  ;;  %vm357_vm12 = vcmp.eq.s32.totalorder %v313_v15, %v2427_v0 }
  0xef   :  { %v1587_v35 = vsel %vm357_vm12, 1.0, %v2130_v3  ;;  %vm139_vm14 = vcmp.eq.s32.totalorder %v2452_v18, %v2427_v0 }
  0xf0   :  { %v405_v46 = vadd.f32 %v1587_v35, %v293_v36  ;;  %v1561_v23 = vsel %vm139_vm14, 1.0, %v2130_v3 }
  0xf1   :  { %v2454_v12 = vpop.permute.xlu0 %324 }
  0xf2   :  { %vm361_vm8 = vcmp.eq.s32.totalorder %v2454_v12, %v2427_v0  ;;  %v517_v60 = vadd.f32 %v1603_v51, %v405_v46 }
  0xf3   :  { %v2458_v20 = vpop.permute.xlu1 %218  ;;  %v1591_v4 = vsel %vm361_vm8, 1.0, %v2130_v3 }
  0xf4   :  { %vm251_vm11 = vcmp.eq.s32.totalorder %v2458_v20, %v2427_v0  ;;  %v409_v15 = vadd.f32 %v1591_v4, %v297_v9 }
  0xf5   :  { %v2466_v21 = vpop.permute.xlu0 %336  ;;  %v1577_v16 = vsel %vm251_vm11, 1.0, %v2130_v3 }
  0xf6   :  { %v299_v26 = vadd.f32 %v1577_v16, %v1561_v23 }
  0xf8   :  { %v322_v27 = vpop.permute.xlu1 %321 }
  0xf9   :  { %v2491_v31 = vpop.permute.xlu0 %348  ;;  %vm360_vm10 = vcmp.eq.s32.totalorder %v322_v27, %v2427_v0 }
  0xfa   :  { %v1590_v6 = vsel %vm360_vm10, 1.0, %v2130_v3 }
  0xfb   :  { %v408_v17 = vadd.f32 %v1590_v6, %v296_v7 }
  0xfc   :  { %v328_v43 = vpop.permute.xlu1 %327 }
  0xfd   :  { %vm362_vm13 = vcmp.eq.s32.totalorder %v328_v43, %v2427_v0 }
  0xfe   :  { %v422_v49 = vpop.permute.xlu0 %421  ;;  %v1592_v19 = vsel %vm362_vm13, 1.0, %v2130_v3 }
  0xff   :  { %vm468_vm9 = vcmp.eq.s32.totalorder %v422_v49, %v2427_v0  ;;  %v410_v29 = vadd.f32 %v1592_v19, %v298_v2 }
 0x100   :  { %v1602_v53 = vsel %vm468_vm9, 1.0, %v2130_v3  ;;  %v331_v55 = vpop.permute.xlu1 %330  ;;  %vm365_vm9 = vcmp.eq.s32.totalorder %v2466_v21, %v2427_v0 }
 0x101   :  { %v516_v59 = vadd.f32 %v1602_v53, %v404_v44  ;;  %vm363_vm15 = vcmp.eq.s32.totalorder %v331_v55, %v2427_v0  ;;  %v1595_v55 = vsel %vm365_vm9, 1.0, %v2130_v3 }
 0x102   :  { %v431_v5 = vpop.permute.xlu0 %430  ;;  %v1593_v24 = vsel %vm363_vm15, 1.0, %v2130_v3 }
 0x103   :  { %vm471_vm12 = vcmp.eq.s32.totalorder %v431_v5, %v2427_v0  ;;  %v2553_v62 = vpack.c.bf16 %v517_v60, %v516_v59  ;;  %v411_v32 = vadd.f32 %v1593_v24, %v299_v26 }
 0x104   :  { %v1605_v1 = vsel %vm471_vm12, 1.0, %v2130_v3 }
 0x105   :  { %v519_v10 = vadd.f32 %v1605_v1, %v407_v48  ;;  %v437_v11 = vpop.permute.xlu1 %436  ;;  %1739 = vmatprep.mubr.bf16.mxu0 %v2553_v62 }
 0x106   :  { %vm473_vm0 = vcmp.eq.s32.totalorder %v437_v11, %v2427_v0  ;;  %v434_v12 = vpop.permute.xlu0 %433 }
 0x107   :  { %v1607_v18 = vsel %vm473_vm0, 1.0, %v2130_v3  ;;  %vm472_vm1 = vcmp.eq.s32.totalorder %v434_v12, %v2427_v0  ;;  %v2569_v22 = vpack.c.bf16 %v519_v10, %v518_v13 }
 0x108   :  { %v521_v25 = vadd.f32 %v1607_v18, %v409_v15  ;;  %v1606_v20 = vsel %vm472_vm1, 1.0, %v2130_v3 }
 0x109   :  { %v520_v27 = vadd.f32 %v1606_v20, %v408_v17  ;;  %v440_v28 = vpop.permute.xlu1 %439  ;;  %1740 = vmatmul.mubr.bf16.vlgmr.msra.gmra.mrb[0].mxu0 %v2569_v22 }
 0x10a   :  { %vm474_vm2 = vcmp.eq.s32.totalorder %v440_v28, %v2427_v0  ;;  %v443_v30 = vpop.permute.xlu0 %442 }
 0x10b   :  { %v1608_v33 = vsel %vm474_vm2, 1.0, %v2130_v3  ;;  %vm475_vm3 = vcmp.eq.s32.totalorder %v443_v30, %v2427_v0  ;;  %v2578_v34 = vpack.c.bf16 %v521_v25, %v520_v27  ;;  %vm145_vm2 = vcmp.eq.s32.totalorder %v2419_v58, %v2427_v0 }
 0x10c   :  { %v522_v35 = vadd.f32 %v1608_v33, %v410_v29  ;;  %v1609_v36 = vsel %vm475_vm3, 1.0, %v2130_v3  ;;  %vm369_vm3 = vcmp.eq.s32.totalorder %v2491_v31, %v2427_v0  ;;  %v1567_v24 = vsel %vm145_vm2, 1.0, %v2130_v3  ;;  %v1945_v33 = vld [vmem:[#allocation2 + $0x30] sm:$0xff]  }
 0x10d   :  { %v523_v37 = vadd.f32 %v1609_v36, %v411_v32  ;;  %1743 = vmatprep.mubr.bf16.mxu0 %v2578_v34  ;;  %v1599_v26 = vsel %vm369_vm3, 1.0, %v2130_v3  ;;  %1767 = vmatprep.subr.bf16.mxu1 %v1945_v33 }
 0x10e   :  { %v110_v38 = vpop.permute.xlu1 %109  ;;  %v446_v46 = vpop.permute.xlu0 %445  ;;  %1768 = vmatpush3.bf16.msra.mxu1 %v1945_v33 }
 0x10f   :  { %v2582_v39 = vpack.c.bf16 %v523_v37, %v522_v35  ;;  %vm140_vm7 = vcmp.eq.s32.totalorder %v110_v38, %v2427_v0  ;;  %vm476_vm11 = vcmp.eq.s32.totalorder %v446_v46, %v2427_v0 }
 0x110   :  { %v1562_v51 = vsel %vm140_vm7, 1.0, %v2130_v3  ;;  %v1610_v60 = vsel %vm476_vm11, 1.0, %v2130_v3 }
 0x111   :  { %1744 = vmatmul.mubr.bf16.gmra.mrb[4].mxu0 %v2582_v39 }
 0x112   :  { %v455_v56 = vpop.permute.xlu0 %454 }
 0x113   :  { %v222_v40 = vpop.permute.xlu1 %221  ;;  %vm479_vm15 = vcmp.eq.s32.totalorder %v455_v56, %v2427_v0 }
 0x114   :  { %vm252_vm4 = vcmp.eq.s32.totalorder %v222_v40, %v2427_v0  ;;  %v1613_v10 = vsel %vm479_vm15, 1.0, %v2130_v3 }
 0x115   :  { %v1578_v47 = vsel %vm252_vm4, 1.0, %v2130_v3 }
 0x116   :  { %v300_v52 = vadd.f32 %v1578_v47, %v1562_v51  ;;  %v458_v32 = vpop.permute.xlu0 %457 }
 0x117   :  { %v225_v41 = vpop.permute.xlu1 %224  ;;  %vm480_vm11 = vcmp.eq.s32.totalorder %v458_v32, %v2427_v0 }
 0x118   :  { %vm253_vm5 = vcmp.eq.s32.totalorder %v225_v41, %v2427_v0  ;;  %v1946_v41 = vld [vmem:[#allocation2 + $0x38] sm:$0xff]  }
 0x119   :  { %v1579_v48 = vsel %vm253_vm5, 1.0, %v2130_v3  ;;  %1769 = vmatprep.subr.bf16.mxu1 %v1946_v41 }
 0x11a   :  { %v301_v53 = vadd.f32 %v1579_v48, %v1563_v50  ;;  %1770 = vmatpush3.bf16.msra.mxu1 %v1946_v41  ;;  %v1614_v48 = vsel %vm480_vm11, 1.0, %v2130_v3 }
 0x11c   :  { %v119_v42 = vpop.permute.xlu1 %118  ;;  %v413_v4 = vadd.f32 %v1595_v55, %v301_v53 }
 0x11d   :  { %vm143_vm12 = vcmp.eq.s32.totalorder %v119_v42, %v2427_v0 }
 0x11e   :  { %v1565_v59 = vsel %vm143_vm12, 1.0, %v2130_v3 }
 0x121   :  { %v231_v43 = vpop.permute.xlu1 %230 }
 0x122   :  { %vm255_vm10 = vcmp.eq.s32.totalorder %v231_v43, %v2427_v0  ;;  %v467_v43 = vpop.permute.xlu0 %466 }
 0x123   :  { %v1581_v21 = vsel %vm255_vm10, 1.0, %v2130_v3 }
 0x124   :  { %v303_v2 = vadd.f32 %v1581_v21, %v1565_v59 }
 0x126   :  { %v334_v44 = vpop.permute.xlu1 %333 }
 0x127   :  { %vm364_vm8 = vcmp.eq.s32.totalorder %v334_v44, %v2427_v0 }
 0x128   :  { %v1594_v54 = vsel %vm364_vm8, 1.0, %v2130_v3 }
 0x129   :  { %v412_v57 = vadd.f32 %v1594_v54, %v300_v52 }
 0x12a   :  { %v340_v45 = vpop.permute.xlu1 %339 }
 0x12b   :  { %vm366_vm14 = vcmp.eq.s32.totalorder %v340_v45, %v2427_v0  ;;  %v524_v7 = vadd.f32 %v1610_v60, %v412_v57 }
 0x12c   :  { %v1596_v5 = vsel %vm366_vm14, 1.0, %v2130_v3  ;;  %vm483_vm14 = vcmp.eq.s32.totalorder %v467_v43, %v2427_v0 }
 0x12d   :  { %v414_v13 = vadd.f32 %v1596_v5, %v2443_v8  ;;  %v1617_v56 = vsel %vm483_vm14, 1.0, %v2130_v3 }
 0x12e   :  { %v343_v49 = vpop.permute.xlu1 %342 }
 0x12f   :  { %vm367_vm13 = vcmp.eq.s32.totalorder %v343_v49, %v2427_v0 }
 0x130   :  { %v1597_v61 = vsel %vm367_vm13, 1.0, %v2130_v3 }
 0x131   :  { %v415_v9 = vadd.f32 %v1597_v61, %v303_v2 }
 0x133   :  { %v449_v63 = vpop.permute.xlu1 %448  ;;  %v527_v17 = vadd.f32 %v1613_v10, %v415_v9 }
 0x134   :  { %vm477_vm0 = vcmp.eq.s32.totalorder %v449_v63, %v2427_v0 }
 0x135   :  { %v1611_v6 = vsel %vm477_vm0, 1.0, %v2130_v3 }
 0x136   :  { %v525_v1 = vadd.f32 %v1611_v6, %v413_v4 }
 0x137   :  { %v452_v11 = vpop.permute.xlu1 %451 }
 0x138   :  { %vm478_vm1 = vcmp.eq.s32.totalorder %v452_v11, %v2427_v0  ;;  %v2615_v15 = vpack.c.bf16 %v525_v1, %v524_v7 }
 0x139   :  { %v1612_v16 = vsel %vm478_vm1, 1.0, %v2130_v3 }
 0x13a   :  { %v526_v12 = vadd.f32 %v1612_v16, %v414_v13  ;;  %1747 = vmatprep.mubr.bf16.mxu0 %v2615_v15 }
 0x13c   :  { %v122_v19 = vpop.permute.xlu1 %121  ;;  %v2619_v18 = vpack.c.bf16 %v527_v17, %v526_v12 }
 0x13d   :  { %vm144_vm6 = vcmp.eq.s32.totalorder %v122_v19, %v2427_v0 }
 0x13e   :  { %1748 = vmatmul.mubr.bf16.gmra.mrb[8].mxu0 %v2619_v18  ;;  %v1566_v36 = vsel %vm144_vm6, 1.0, %v2130_v3 }
 0x141   :  { %v234_v23 = vpop.permute.xlu1 %233 }
 0x142   :  { %vm256_vm5 = vcmp.eq.s32.totalorder %v234_v23, %v2427_v0 }
 0x143   :  { %v1582_v31 = vsel %vm256_vm5, 1.0, %v2130_v3 }
 0x144   :  { %v304_v38 = vadd.f32 %v1582_v31, %v1566_v36 }
 0x145   :  { %v237_v8 = vpop.permute.xlu1 %236 }
 0x146   :  { %vm257_vm4 = vcmp.eq.s32.totalorder %v237_v8, %v2427_v0 }
 0x147   :  { %v1583_v25 = vsel %vm257_vm4, 1.0, %v2130_v3 }
 0x148   :  { %v305_v20 = vadd.f32 %v1583_v25, %v1567_v24 }
 0x14a   :  { %v131_v27 = vpop.permute.xlu1 %130  ;;  %v417_v28 = vadd.f32 %v1599_v26, %v305_v20 }
 0x14b   :  { %vm147_vm9 = vcmp.eq.s32.totalorder %v131_v27, %v2427_v0 }
 0x14c   :  { %v1569_v44 = vsel %vm147_vm9, 1.0, %v2130_v3 }
 0x14f   :  { %v243_v29 = vpop.permute.xlu1 %242 }
 0x150   :  { %vm259_vm8 = vcmp.eq.s32.totalorder %v243_v29, %v2427_v0 }
 0x151   :  { %v1585_v40 = vsel %vm259_vm8, 1.0, %v2130_v3 }
 0x152   :  { %v307_v47 = vadd.f32 %v1585_v40, %v1569_v44 }
 0x154   :  { %v346_v30 = vpop.permute.xlu1 %345 }
 0x155   :  { %vm368_vm7 = vcmp.eq.s32.totalorder %v346_v30, %v2427_v0 }
 0x156   :  { %v1598_v37 = vsel %vm368_vm7, 1.0, %v2130_v3 }
 0x157   :  { %v416_v42 = vadd.f32 %v1598_v37, %v304_v38 }
 0x158   :  { %v352_v58 = vpop.permute.xlu1 %351 }
 0x159   :  { %vm370_vm12 = vcmp.eq.s32.totalorder %v352_v58, %v2427_v0  ;;  %v528_v51 = vadd.f32 %v1614_v48, %v416_v42 }
 0x15a   :  { %v1600_v49 = vsel %vm370_vm12, 1.0, %v2130_v3 }
 0x15b   :  { %v418_v55 = vadd.f32 %v1600_v49, %v2450_v14 }
 0x15c   :  { %v355_v35 = vpop.permute.xlu1 %354 }
 0x15d   :  { %vm371_vm10 = vcmp.eq.s32.totalorder %v355_v35, %v2427_v0 }
 0x15e   :  { %v1601_v45 = vsel %vm371_vm10, 1.0, %v2130_v3 }
 0x15f   :  { %v419_v54 = vadd.f32 %v1601_v45, %v307_v47 }
 0x161   :  { %v461_v46 = vpop.permute.xlu1 %460  ;;  %v531_v59 = vadd.f32 %v1617_v56, %v419_v54 }
 0x162   :  { %vm481_vm13 = vcmp.eq.s32.totalorder %v461_v46, %v2427_v0 }
 0x163   :  { %v1615_v50 = vsel %vm481_vm13, 1.0, %v2130_v3 }
 0x164   :  { %v529_v52 = vadd.f32 %v1615_v50, %v417_v28 }
 0x165   :  { %v464_v53 = vpop.permute.xlu1 %463 }
 0x166   :  { %vm482_vm15 = vcmp.eq.s32.totalorder %v464_v53, %v2427_v0  ;;  %v2651_v21 = vpack.c.bf16 %v529_v52, %v528_v51 }
 0x167   :  { %v1616_v57 = vsel %vm482_vm15, 1.0, %v2130_v3 }
 0x168   :  { %v530_v60 = vadd.f32 %v1616_v57, %v418_v55  ;;  %1751 = vmatprep.mubr.bf16.mxu0 %v2651_v21 }
 0x16a   :  { %v2656_v61 = vpack.c.bf16 %v531_v59, %v530_v60  ;;  %v1947_v60 = vld [vmem:[#allocation5] sm:$0xff]  }
 0x16b   :  { %1819 = vmatprep.subr.bf16.mxu1 %v1947_v60 }
 0x16c   :  { %1752 = vmatmul.mubr.bf16.gmra.mrb[12].mxu0 %v2656_v61 }
 0x16d   :  { %1803 = vmatprep.mubr.bf16.mxu0 %v2553_v62 }
 0x1dc   :  { %v1741_v63 = vpop.f32.mrb[0].mxu0 }
 0x1dd   :  { %v598_v14 = vpop.f32.mrb[1].mxu0  ;;  %v663_v0 = vmul.f32 0.25, %v1741_v63  ;;  %v1948_v63 = vld [vmem:[#allocation5 + $0x8] sm:$0xff]  }
 0x1de   :  { %v1742_v2 = vpop.f32.mrb[2].mxu0  ;;  %v661_v6 = vmul.f32 0.25, %v598_v14 }
 0x1df   :  { %v664_v4 = vmul.f32 0.25, %v1742_v2  ;;  %v601_v5 = vpop.f32.mrb[3].mxu0 }
 0x1e0   :  { %v662_v7 = vmul.f32 0.25, %v601_v5  ;;  %v1949_v5 = vld [vmem:[#allocation5 + $0x10] sm:$0xff]  }
 0x1e1   :  { %v678_v9 = vpack.c.bf16 %v664_v4, %v663_v0 }
 0x1e2   :  { %v677_v3 = vpack.c.bf16 %v662_v7, %v661_v6  ;;  %v1950_v6 = vld [vmem:[#allocation5 + $0x18] sm:$0xff]   ;;  %v1951_v7 = vld [vmem:[#allocation5 + $0x20] sm:$0xff]  }
 0x1e4   :  { %v1745_v1 = vpop.f32.mrb[4].mxu0  ;;  %1771 = vmatprep.mubr.bf16.mxu1 %v677_v3 }
 0x1e5   :  { %v614_v10 = vpop.f32.mrb[5].mxu0  ;;  %1772 = vmatmul.mubr.bf16.vlgmr.msra.gmra.mrb[0].mxu1 %v678_v9  ;;  %v667_v13 = vmul.f32 0.25, %v1745_v1  ;;  %v1952_v9 = vld [vmem:[#allocation5 + $0x28] sm:$0xff]  }
 0x1e6   :  { %v1746_v11 = vpop.f32.mrb[6].mxu0  ;;  %v665_v12 = vmul.f32 0.25, %v614_v10  ;;  %1820 = vmatpush3.bf16.msra.mxu1 %v1947_v60 }
 0x1e7   :  { %v668_v16 = vmul.f32 0.25, %v1746_v11  ;;  %v617_v17 = vpop.f32.mrb[7].mxu0  ;;  %1821 = vmatprep.subr.bf16.mxu1 %v1948_v63 }
 0x1e8   :  { %v666_v62 = vmul.f32 0.25, %v617_v17 }
 0x1e9   :  { %v680_v19 = vpack.c.bf16 %v668_v16, %v667_v13 }
 0x1ea   :  { %v679_v23 = vpack.c.bf16 %v666_v62, %v665_v12  ;;  %1822 = vmatpush3.bf16.msra.mxu1 %v1948_v63 }
 0x1eb   :  { %1823 = vmatprep.subr.bf16.mxu1 %v1949_v5 }
 0x1ec   :  { %1775 = vmatprep.mubr.bf16.mxu1 %v679_v23 }
 0x1ed   :  { %1776 = vmatmul.mubr.bf16.gmra.mrb[4].mxu1 %v680_v19 }
 0x1ee   :  { %1824 = vmatpush3.bf16.msra.mxu1 %v1949_v5 }
 0x1ef   :  { %1825 = vmatprep.subr.bf16.mxu1 %v1950_v6 }
 0x1f2   :  { %1826 = vmatpush3.bf16.msra.mxu1 %v1950_v6 }
 0x1f3   :  { %1827 = vmatprep.subr.bf16.mxu1 %v1951_v7 }
 0x1f6   :  { %1828 = vmatpush3.bf16.msra.mxu1 %v1951_v7 }
 0x1f7   :  { %1829 = vmatprep.subr.bf16.mxu1 %v1952_v9 }
 0x1fa   :  { %1830 = vmatpush3.bf16.msra.mxu1 %v1952_v9 }
 0x211   :  { %v1749_v8 = vpop.f32.mrb[8].mxu0 }
 0x212   :  { %v630_v24 = vpop.f32.mrb[9].mxu0  ;;  %v671_v20 = vmul.f32 0.25, %v1749_v8 }
 0x213   :  { %v1750_v25 = vpop.f32.mrb[10].mxu0  ;;  %v669_v28 = vmul.f32 0.25, %v630_v24 }
 0x214   :  { %v672_v26 = vmul.f32 0.25, %v1750_v25  ;;  %v633_v27 = vpop.f32.mrb[11].mxu0 }
 0x215   :  { %v670_v29 = vmul.f32 0.25, %v633_v27 }
 0x216   :  { %v682_v30 = vpack.c.bf16 %v672_v26, %v671_v20 }
 0x217   :  { %v681_v58 = vpack.c.bf16 %v670_v29, %v669_v28 }
 0x219   :  { %1779 = vmatprep.mubr.bf16.mxu1 %v681_v58  ;;  %v1953_v58 = vld [vmem:[#allocation5 + $0x30] sm:$0xff]  }
 0x21a   :  { %1780 = vmatmul.mubr.bf16.gmra.mrb[8].mxu1 %v682_v30  ;;  %1831 = vmatprep.subr.bf16.mxu1 %v1953_v58 }
 0x21b   :  { %1832 = vmatpush3.bf16.msra.mxu1 %v1953_v58 }
 0x23f   :  { %v1753_v31 = vpop.f32.mrb[12].mxu0 }
 0x240   :  { %v646_v32 = vpop.f32.mrb[13].mxu0  ;;  %v675_v35 = vmul.f32 0.25, %v1753_v31  ;;  %v1954_v31 = vld [vmem:[#allocation5 + $0x38] sm:$0xff]  }
 0x241   :  { %v1754_v33 = vpop.f32.mrb[14].mxu0  ;;  %v673_v38 = vmul.f32 0.25, %v646_v32  ;;  %1833 = vmatprep.subr.bf16.mxu1 %v1954_v31  ;;  %v1955_v32 = vld [vmem:[#allocation7] sm:$0xff]  }
 0x242   :  { %v676_v36 = vmul.f32 0.25, %v1754_v33  ;;  %v649_v37 = vpop.f32.mrb[15].mxu0  ;;  %1834 = vmatpush3.bf16.msra.mxu1 %v1954_v31 }
 0x243   :  { %v674_v40 = vmul.f32 0.25, %v649_v37  ;;  %1883 = vmatprep.subr.bf16.mxu1 %v1955_v32 }
 0x244   :  { %v684_v41 = vpack.c.bf16 %v676_v36, %v675_v35 }
 0x245   :  { %v683_v42 = vpack.c.bf16 %v674_v40, %v673_v38 }
 0x247   :  { %1783 = vmatprep.mubr.bf16.mxu1 %v683_v42 }
 0x248   :  { %1784 = vmatmul.mubr.bf16.gmra.mrb[12].mxu1 %v684_v41 }
 0x2b8   :  { %v1773_v43 = vpop.f32.mrb[0].mxu1 }
 0x2b9   :  { %v783_v44 = vpop.f32.mrb[1].mxu1  ;;  %v848_v46 = vmax.f32 %v1773_v43, 0.0 }
 0x2ba   :  { %v1774_v45 = vpop.f32.mrb[2].mxu1  ;;  %v846_v49 = vmax.f32 %v783_v44, 0.0 }
 0x2bb   :  { %v849_v47 = vmax.f32 %v1774_v45, 0.0  ;;  %v786_v48 = vpop.f32.mrb[3].mxu1 }
 0x2bc   :  { %v847_v50 = vmax.f32 %v786_v48, 0.0 }
 0x2bd   :  { %v863_v51 = vpack.c.bf16 %v849_v47, %v848_v46 }
 0x2be   :  { %v862_v54 = vpack.c.bf16 %v847_v50, %v846_v49 }
 0x2c0   :  { %v1777_v52 = vpop.f32.mrb[4].mxu1  ;;  %1787 = vmatprep.subr.bf16.mxu0 %v862_v54 }
 0x2c1   :  { %v799_v53 = vpop.f32.mrb[5].mxu1  ;;  %1788 = vmatpush3.bf16.msra.mxu0 %v862_v54  ;;  %v852_v56 = vmax.f32 %v1777_v52, 0.0 }
 0x2c2   :  { %v1778_v55 = vpop.f32.mrb[6].mxu1  ;;  %1789 = vmatprep.subr.bf16.mxu0 %v863_v51  ;;  %v850_v14 = vmax.f32 %v799_v53, 0.0 }
 0x2c3   :  { %v853_v57 = vmax.f32 %v1778_v55, 0.0  ;;  %v802_v59 = vpop.f32.mrb[7].mxu1 }
 0x2c4   :  { %v851_v2 = vmax.f32 %v802_v59, 0.0 }
 0x2c5   :  { %v865_v0 = vpack.c.bf16 %v853_v57, %v852_v56  ;;  %1790 = vmatpush3.bf16.msra.mxu0 %v863_v51 }
 0x2c6   :  { %v864_v4 = vpack.c.bf16 %v851_v2, %v850_v14 }
 0x2c8   :  { %1791 = vmatprep.subr.bf16.mxu0 %v864_v4 }
 0x2c9   :  { %1792 = vmatpush3.bf16.msra.mxu0 %v864_v4 }
 0x2ca   :  { %1793 = vmatprep.subr.bf16.mxu0 %v865_v0 }
 0x2cd   :  { %1794 = vmatpush3.bf16.msra.mxu0 %v865_v0 }
 0x2ed   :  { %v1781_v3 = vpop.f32.mrb[8].mxu1 }
 0x2ee   :  { %v815_v1 = vpop.f32.mrb[9].mxu1  ;;  %v856_v11 = vmax.f32 %v1781_v3, 0.0 }
 0x2ef   :  { %v1782_v10 = vpop.f32.mrb[10].mxu1  ;;  %v854_v17 = vmax.f32 %v815_v1, 0.0 }
 0x2f0   :  { %v857_v13 = vmax.f32 %v1782_v10, 0.0  ;;  %v818_v16 = vpop.f32.mrb[11].mxu1 }
 0x2f1   :  { %v855_v12 = vmax.f32 %v818_v16, 0.0  ;;  %v1962_v16 = vld [vmem:[#allocation7 + $0x38] sm:$0xff]  }
 0x2f2   :  { %v867_v62 = vpack.c.bf16 %v857_v13, %v856_v11  ;;  %v1961_v13 = vld [vmem:[#allocation7 + $0x30] sm:$0xff]  }
 0x2f3   :  { %v866_v19 = vpack.c.bf16 %v855_v12, %v854_v17 }
 0x2f5   :  { %1795 = vmatprep.subr.bf16.mxu0 %v866_v19 }
 0x2f6   :  { %1796 = vmatpush3.bf16.msra.mxu0 %v866_v19 }
 0x2f7   :  { %1797 = vmatprep.subr.bf16.mxu0 %v867_v62 }
 0x2fa   :  { %1798 = vmatpush3.bf16.msra.mxu0 %v867_v62 }
 0x31b   :  { %v1785_v23 = vpop.f32.mrb[12].mxu1 }
 0x31c   :  { %v831_v8 = vpop.f32.mrb[13].mxu1  ;;  %v860_v25 = vmax.f32 %v1785_v23, 0.0 }
 0x31d   :  { %v1786_v24 = vpop.f32.mrb[14].mxu1  ;;  %v858_v27 = vmax.f32 %v831_v8, 0.0 }
 0x31e   :  { %v861_v20 = vmax.f32 %v1786_v24, 0.0  ;;  %v834_v26 = vpop.f32.mrb[15].mxu1 }
 0x31f   :  { %v859_v28 = vmax.f32 %v834_v26, 0.0 }
 0x320   :  { %v869_v29 = vpack.c.bf16 %v861_v20, %v860_v25 }
 0x321   :  { %v868_v30 = vpack.c.bf16 %v859_v28, %v858_v27 }
 0x323   :  { %1799 = vmatprep.subr.bf16.mxu0 %v868_v30 }
 0x324   :  { %1800 = vmatpush3.bf16.msra.mxu0 %v868_v30 }
 0x325   :  { %1801 = vmatprep.subr.bf16.mxu0 %v869_v29 }
 0x328   :  { %1802 = vmatpush3.bf16.msra.mxu0 %v869_v29 }
 0x329   :  { %1851 = vmatprep.subr.bf16.mxu0 %v1955_v32 }
 0x32b   :  { %1804 = vmatmul.mubr.bf16.vlgmr.msra.gmra.mrb[16].mxu0 %v2569_v22  ;;  %v1956_v22 = vld [vmem:[#allocation7 + $0x8] sm:$0xff]  }
 0x32c   :  { %1807 = vmatprep.mubr.bf16.mxu0 %v2578_v34  ;;  %1852 = vmatpush3.bf16.msra.mxu0 %v1955_v32  ;;  %v1957_v34 = vld [vmem:[#allocation7 + $0x10] sm:$0xff]  }
 0x32d   :  { %1853 = vmatprep.subr.bf16.mxu0 %v1956_v22 }
 0x330   :  { %1854 = vmatpush3.bf16.msra.mxu0 %v1956_v22 }
 0x331   :  { %1855 = vmatprep.subr.bf16.mxu0 %v1957_v34 }
 0x333   :  { %1808 = vmatmul.mubr.bf16.gmra.mrb[20].mxu0 %v2582_v39  ;;  %v1958_v39 = vld [vmem:[#allocation7 + $0x18] sm:$0xff]  }
 0x334   :  { %1811 = vmatprep.mubr.bf16.mxu0 %v2615_v15  ;;  %1856 = vmatpush3.bf16.msra.mxu0 %v1957_v34  ;;  %v1959_v15 = vld [vmem:[#allocation7 + $0x20] sm:$0xff]  }
 0x335   :  { %1857 = vmatprep.subr.bf16.mxu0 %v1958_v39 }
 0x338   :  { %1858 = vmatpush3.bf16.msra.mxu0 %v1958_v39 }
 0x339   :  { %1859 = vmatprep.subr.bf16.mxu0 %v1959_v15 }
 0x33b   :  { %1812 = vmatmul.mubr.bf16.gmra.mrb[24].mxu0 %v2619_v18  ;;  %v1960_v18 = vld [vmem:[#allocation7 + $0x28] sm:$0xff]  }
 0x33c   :  { %1815 = vmatprep.mubr.bf16.mxu0 %v2651_v21  ;;  %1860 = vmatpush3.bf16.msra.mxu0 %v1959_v15 }
 0x33d   :  { %1861 = vmatprep.subr.bf16.mxu0 %v1960_v18 }
 0x340   :  { %1862 = vmatpush3.bf16.msra.mxu0 %v1960_v18 }
 0x341   :  { %1863 = vmatprep.subr.bf16.mxu0 %v1961_v13 }
 0x343   :  { %1816 = vmatmul.mubr.bf16.gmra.mrb[28].mxu0 %v2656_v61 }
 0x344   :  { %1864 = vmatpush3.bf16.msra.mxu0 %v1961_v13 }
 0x345   :  { %1865 = vmatprep.subr.bf16.mxu0 %v1962_v16 }
 0x348   :  { %1866 = vmatpush3.bf16.msra.mxu0 %v1962_v16 }
 0x3fe   :  { %v1805_v21 = vpop.f32.mrb[16].mxu0 }
 0x3ff   :  { %v904_v61 = vpop.f32.mrb[17].mxu0  ;;  %v969_v35 = vmul.f32 0.25, %v1805_v21 }
 0x400   :  { %v1806_v33 = vpop.f32.mrb[18].mxu0  ;;  %v967_v38 = vmul.f32 0.25, %v904_v61 }
 0x401   :  { %v970_v36 = vmul.f32 0.25, %v1806_v33  ;;  %v907_v37 = vpop.f32.mrb[19].mxu0 }
 0x402   :  { %v968_v40 = vmul.f32 0.25, %v907_v37 }
 0x403   :  { %v984_v41 = vpack.c.bf16 %v970_v36, %v969_v35 }
 0x404   :  { %v983_v42 = vpack.c.bf16 %v968_v40, %v967_v38 }
 0x406   :  { %v1809_v43 = vpop.f32.mrb[20].mxu0  ;;  %1835 = vmatprep.mubr.bf16.mxu1 %v983_v42 }
 0x407   :  { %v920_v44 = vpop.f32.mrb[21].mxu0  ;;  %1836 = vmatmul.mubr.bf16.vlgmr.msra.gmra.mrb[16].mxu1 %v984_v41  ;;  %v973_v46 = vmul.f32 0.25, %v1809_v43 }
 0x408   :  { %v1810_v45 = vpop.f32.mrb[22].mxu0  ;;  %1891 = vmatpush3.bf16.msra.mxu1 %v1955_v32  ;;  %v971_v49 = vmul.f32 0.25, %v920_v44 }
 0x409   :  { %v974_v47 = vmul.f32 0.25, %v1810_v45  ;;  %v923_v48 = vpop.f32.mrb[23].mxu0  ;;  %1884 = vmatprep.subr.bf16.mxu1 %v1956_v22 }
 0x40a   :  { %v972_v50 = vmul.f32 0.25, %v923_v48 }
 0x40b   :  { %v986_v51 = vpack.c.bf16 %v974_v47, %v973_v46 }
 0x40c   :  { %v985_v54 = vpack.c.bf16 %v972_v50, %v971_v49  ;;  %1892 = vmatpush3.bf16.msra.mxu1 %v1956_v22 }
 0x40d   :  { %1885 = vmatprep.subr.bf16.mxu1 %v1957_v34 }
 0x40e   :  { %v1813_v52 = vpop.f32.mrb[24].mxu0  ;;  %1839 = vmatprep.mubr.bf16.mxu1 %v985_v54 }
 0x40f   :  { %v936_v53 = vpop.f32.mrb[25].mxu0  ;;  %1840 = vmatmul.mubr.bf16.gmra.mrb[20].mxu1 %v986_v51  ;;  %v977_v56 = vmul.f32 0.25, %v1813_v52  ;;  %v1634_v51 = vld [vmem:[%s2831_s5] ss:$0 sm:$0xff]  ;;  %s2131_s5 = smov [#allocation8]  }
 0x410   :  { %v1814_v55 = vpop.f32.mrb[26].mxu0  ;;  %1893 = vmatpush3.bf16.msra.mxu1 %v1957_v34  ;;  %v975_v60 = vmul.f32 0.25, %v936_v53  ;;  %s1541_s18 = sshll.u32 %s2131_s5, 4  ;;  %s1542_s18 = int_to_ptr.vmem [resolvable:$true] %s1541_s18 }
 0x411   :  { %v978_v57 = vmul.f32 0.25, %v1814_v55  ;;  %v939_v59 = vpop.f32.mrb[27].mxu0  ;;  %1886 = vmatprep.subr.bf16.mxu1 %v1958_v39  ;;  %s2093_s19 = scalar_lea.vmem %s1542_s18, 2048  ;;  %p2098_p11 = scmp.lt.s32.totalorder %s1542_s18, %s1542_s18 }
 0x412   :  { %v976_v63 = vmul.f32 0.25, %v939_v59  ;;  %p2094_p10 = scmp.ne.s32.totalorder %s1542_s18, %s2093_s19  ;;  %p2099_p12 = scmp.lt.s32.totalorder %s2093_s19, %s2093_s19 }
 0x413   :  { %v988_v14 = vpack.c.bf16 %v978_v57, %v977_v56 }
 0x414   :  { %v987_v2 = vpack.c.bf16 %v976_v63, %v975_v60  ;;  %1894 = vmatpush3.bf16.msra.mxu1 %v1958_v39  ;;  %p2100_p13 = por %p2099_p12, %p2098_p11 }
 0x415   :  { %1887 = vmatprep.subr.bf16.mxu1 %v1959_v15 }
 0x416   :  { %v1817_v0 = vpop.f32.mrb[28].mxu0  ;;  %1843 = vmatprep.mubr.bf16.mxu1 %v987_v2  ;;  %p2101_p0 = pnand %p2100_p13, %p2094_p10 }
 0x417   :  { %v952_v4 = vpop.f32.mrb[29].mxu0  ;;  %1844 = vmatmul.mubr.bf16.gmra.mrb[24].mxu1 %v988_v14  ;;  %v981_v6 = vmul.f32 0.25, %v1817_v0 }
 0x418   :  { %v1818_v5 = vpop.f32.mrb[30].mxu0  ;;  %1895 = vmatpush3.bf16.msra.mxu1 %v1959_v15  ;;  %v979_v3 = vmul.f32 0.25, %v952_v4 }
 0x419   :  { %v982_v7 = vmul.f32 0.25, %v1818_v5  ;;  %v955_v9 = vpop.f32.mrb[31].mxu0  ;;  %1888 = vmatprep.subr.bf16.mxu1 %v1960_v18 }
 0x41a   :  { %v980_v1 = vmul.f32 0.25, %v955_v9 }
 0x41b   :  { %v990_v10 = vpack.c.bf16 %v982_v7, %v981_v6 }
 0x41c   :  { %v989_v11 = vpack.c.bf16 %v980_v1, %v979_v3  ;;  %1896 = vmatpush3.bf16.msra.mxu1 %v1960_v18 }
 0x41d   :  { %1889 = vmatprep.subr.bf16.mxu1 %v1961_v13 }
 0x41e   :  { %1847 = vmatprep.mubr.bf16.mxu1 %v989_v11 }
 0x41f   :  { %1848 = vmatmul.mubr.bf16.gmra.mrb[28].mxu1 %v990_v10 }
 0x420   :  { %1897 = vmatpush3.bf16.msra.mxu1 %v1961_v13 }
 0x421   :  { %1890 = vmatprep.subr.bf16.mxu1 %v1962_v16 }
 0x424   :  { %1898 = vmatpush3.bf16.msra.mxu1 %v1962_v16 }
 0x4da   :  { %v1837_v17 = vpop.f32.mrb[16].mxu1 }
 0x4db   :  { %v1089_v12 = vpop.f32.mrb[17].mxu1  ;;  %v1154_v19 = vmax.f32 %v1837_v17, 0.0 }
 0x4dc   :  { %v1838_v62 = vpop.f32.mrb[18].mxu1  ;;  %v1152_v24 = vmax.f32 %v1089_v12, 0.0 }
 0x4dd   :  { %v1155_v23 = vmax.f32 %v1838_v62, 0.0  ;;  %v1092_v8 = vpop.f32.mrb[19].mxu1 }
 0x4de   :  { %v1153_v25 = vmax.f32 %v1092_v8, 0.0 }
 0x4df   :  { %v1169_v20 = vpack.c.bf16 %v1155_v23, %v1154_v19 }
 0x4e0   :  { %v1168_v26 = vpack.c.bf16 %v1153_v25, %v1152_v24 }
 0x4e2   :  { %v1841_v27 = vpop.f32.mrb[20].mxu1  ;;  %1867 = vmatprep.mubr.bf16.mxu0 %v1168_v26 }
 0x4e3   :  { %v1105_v28 = vpop.f32.mrb[21].mxu1  ;;  %1868 = vmatmul.mubr.bf16.vlgmr.msra.gmra.mrb[32].mxu0 %v1169_v20  ;;  %v1158_v30 = vmax.f32 %v1841_v27, 0.0 }
 0x4e4   :  { %v1842_v29 = vpop.f32.mrb[22].mxu1  ;;  %v1156_v32 = vmax.f32 %v1105_v28, 0.0 }
 0x4e5   :  { %v1159_v58 = vmax.f32 %v1842_v29, 0.0  ;;  %v1108_v31 = vpop.f32.mrb[23].mxu1 }
 0x4e6   :  { %v1157_v22 = vmax.f32 %v1108_v31, 0.0 }
 0x4e7   :  { %v1171_v34 = vpack.c.bf16 %v1159_v58, %v1158_v30 }
 0x4e8   :  { %v1170_v39 = vpack.c.bf16 %v1157_v22, %v1156_v32 }
 0x4ea   :  { %v1845_v15 = vpop.f32.mrb[24].mxu1  ;;  %1871 = vmatprep.mubr.bf16.mxu0 %v1170_v39 }
 0x4eb   :  { %v1121_v18 = vpop.f32.mrb[25].mxu1  ;;  %1872 = vmatmul.mubr.bf16.gmra.mrb[36].mxu0 %v1171_v34  ;;  %v1162_v61 = vmax.f32 %v1845_v15, 0.0 }
 0x4ec   :  { %v1846_v21 = vpop.f32.mrb[26].mxu1  ;;  %v1160_v36 = vmax.f32 %v1121_v18, 0.0 }
 0x4ed   :  { %v1163_v33 = vmax.f32 %v1846_v21, 0.0  ;;  %v1124_v35 = vpop.f32.mrb[27].mxu1 }
 0x4ee   :  { %v1161_v37 = vmax.f32 %v1124_v35, 0.0 }
 0x4ef   :  { %v1173_v38 = vpack.c.bf16 %v1163_v33, %v1162_v61 }
 0x4f0   :  { %v1172_v40 = vpack.c.bf16 %v1161_v37, %v1160_v36 }
 0x4f2   :  { %v1849_v41 = vpop.f32.mrb[28].mxu1  ;;  %1875 = vmatprep.mubr.bf16.mxu1 %v1172_v40 }
 0x4f3   :  { %v1137_v42 = vpop.f32.mrb[29].mxu1  ;;  %1876 = vmatmul.mubr.bf16.vlgmr.msra.gmra.mrb[32].mxu1 %v1173_v38  ;;  %v1166_v44 = vmax.f32 %v1849_v41, 0.0 }
 0x4f4   :  { %v1850_v43 = vpop.f32.mrb[30].mxu1  ;;  %v1164_v47 = vmax.f32 %v1137_v42, 0.0 }
 0x4f5   :  { %v1167_v45 = vmax.f32 %v1850_v43, 0.0  ;;  %v1140_v46 = vpop.f32.mrb[31].mxu1 }
 0x4f6   :  { %v1165_v48 = vmax.f32 %v1140_v46, 0.0 }
 0x4f7   :  { %v1175_v49 = vpack.c.bf16 %v1167_v45, %v1166_v44 }
 0x4f8   :  { %v1174_v50 = vpack.c.bf16 %v1165_v48, %v1164_v47 }
 0x4fa   :  { %1879 = vmatprep.mubr.bf16.mxu1 %v1174_v50 }
 0x4fb   :  { %1880 = vmatmul.mubr.bf16.gmra.mrb[36].mxu1 %v1175_v49 }
 0x5b6   :  { %v1869_v54 = vpop.f32.mrb[32].mxu0 }
 0x5b7   :  { %v2670_v52 = vadd.f32 %v1869_v54, %v1634_v51  ;;  %v1281_v53 = vpop.f32.mrb[33].mxu0 }
 0x5b8   :  { %v2672_v55 = vadd.f32 %v1634_v51, %v1281_v53  ;;  %v1870_v56 = vpop.f32.mrb[34].mxu0 }
 0x5b9   :  { %1348 = vmax.xlane.f32.xlu0 %v2670_v52  ;;  %v1284_v57 = vpop.f32.mrb[35].mxu0  ;;  %v2678_v60 = vadd.f32 %v1870_v56, %v1634_v51 }
 0x5ba   :  { %v2675_v59 = vadd.f32 %v1634_v51, %v1284_v57  ;;  %1344 = vmax.xlane.f32.xlu1 %v2672_v55 }
 0x5bd   :  { %1346 = vmax.xlane.f32.xlu0 %v2675_v59 }
 0x5be   :  { %v1873_v63 = vpop.f32.mrb[36].mxu0  ;;  %1350 = vmax.xlane.f32.xlu1 %v2678_v60 }
 0x5bf   :  { %v2682_v14 = vadd.f32 %v1873_v63, %v1634_v51  ;;  %v1297_v2 = vpop.f32.mrb[37].mxu0 }
 0x5c0   :  { %v1874_v0 = vpop.f32.mrb[38].mxu0  ;;  %v2687_v6 = vadd.f32 %v1634_v51, %v1297_v2 }
 0x5c1   :  { %v2684_v4 = vadd.f32 %v1874_v0, %v1634_v51  ;;  %v1300_v5 = vpop.f32.mrb[39].mxu0  ;;  %1356 = vmax.xlane.f32.xlu0 %v2682_v14 }
 0x5c2   :  { %v2690_v7 = vadd.f32 %v1634_v51, %v1300_v5 }
 0x5c3   :  { %1358 = vmax.xlane.f32.xlu1 %v2684_v4 }
 0x5c5   :  { %1352 = vmax.xlane.f32.xlu0 %v2687_v6 }
 0x5c6   :  { %v1877_v9 = vpop.f32.mrb[32].mxu1 }
 0x5c7   :  { %v2693_v3 = vadd.f32 %v1877_v9, %v1634_v51  ;;  %1354 = vmax.xlane.f32.xlu1 %v2690_v7  ;;  %v1313_v1 = vpop.f32.mrb[33].mxu1 }
 0x5c8   :  { %v1878_v10 = vpop.f32.mrb[34].mxu1  ;;  %v2699_v16 = vadd.f32 %v1634_v51, %v1313_v1 }
 0x5c9   :  { %v2696_v11 = vadd.f32 %v1878_v10, %v1634_v51  ;;  %1364 = vmax.xlane.f32.xlu0 %v2693_v3  ;;  %v1316_v13 = vpop.f32.mrb[35].mxu1 }
 0x5ca   :  { %v2702_v17 = vadd.f32 %v1634_v51, %v1316_v13 }
 0x5cb   :  { %1366 = vmax.xlane.f32.xlu1 %v2696_v11 }
 0x5cd   :  { %1360 = vmax.xlane.f32.xlu0 %v2699_v16 }
 0x5ce   :  { %v1881_v12 = vpop.f32.mrb[36].mxu1 }
 0x5cf   :  { %1362 = vmax.xlane.f32.xlu1 %v2702_v17  ;;  %v1329_v62 = vpop.f32.mrb[37].mxu1  ;;  %v2711_v25 = vadd.f32 %v1881_v12, %v1634_v51 }
 0x5d0   :  { %v2706_v19 = vadd.f32 %v1634_v51, %v1329_v62  ;;  %v1882_v23 = vpop.f32.mrb[38].mxu1 }
 0x5d1   :  { %v1332_v8 = vpop.f32.mrb[39].mxu1  ;;  %v2714_v20 = vadd.f32 %v1882_v23, %v1634_v51 }
 0x5d2   :  { %v2708_v24 = vadd.f32 %v1634_v51, %v1332_v8  ;;  %1368 = vmax.xlane.f32.xlu0 %v2706_v19 }
 0x5d4   :  { %1370 = vmax.xlane.f32.xlu1 %v2708_v24 }
 0x5d6   :  { %1372 = vmax.xlane.f32.xlu0 %v2711_v25 }
 0x5d8   :  { %1374 = vmax.xlane.f32.xlu1 %v2714_v20 }
 0x646   :  { %v2718_v26 = vpop.xlane.xlu0 %1348 }
 0x647   :  { %v1378_v27 = vsub.f32 %v2670_v52, %v2718_v26  ;;  %v2722_v28 = vpop.xlane.xlu1 %1344 }
 0x648   :  { %v1376_v29 = vsub.f32 %v2672_v55, %v2722_v28 }
 0x649   :  { %v1396_v30 = vmul.f32 1.442695, %v1378_v27 }
 0x64a   :  { %v2726_v58 = vpop.xlane.xlu0 %1346  ;;  %v1392_v31 = vmul.f32 1.442695, %v1376_v29 }
 0x64b   :  { %1963 = vpow2.f32 %v1396_v30  ;;  %v2728_v32 = vpop.xlane.xlu1 %1350  ;;  %v1377_v22 = vsub.f32 %v2675_v59, %v2726_v58 }
 0x64c   :  { %v1379_v34 = vsub.f32 %v2678_v60, %v2728_v32  ;;  %1965 = vpow2.f32 %v1392_v31 }
 0x64d   :  { %v1394_v21 = vmul.f32 1.442695, %v1377_v22 }
 0x64e   :  { %v1398_v39 = vmul.f32 1.442695, %v1379_v34  ;;  %v2734_v15 = vpop.xlane.xlu0 %1356 }
 0x64f   :  { %v1382_v18 = vsub.f32 %v2682_v14, %v2734_v15 }
 0x650   :  { %1967 = vpow2.f32 %v1398_v39  ;;  %v2738_v61 = vpop.xlane.xlu1 %1358 }
 0x651   :  { %v1404_v33 = vmul.f32 1.442695, %v1382_v18  ;;  %v1383_v35 = vsub.f32 %v2684_v4, %v2738_v61 }
 0x652   :  { %v2742_v36 = vpop.xlane.xlu0 %1352 }
 0x653   :  { %1969 = vpow2.f32 %v1404_v33  ;;  %v1380_v37 = vsub.f32 %v2687_v6, %v2742_v36  ;;  %v1406_v38 = vmul.f32 1.442695, %v1383_v35 }
 0x654   :  { %1971 = vpow2.f32 %v1394_v21  ;;  %v2746_v40 = vpop.xlane.xlu1 %1354 }
 0x655   :  { %v1964_v41 = vpop.eup %1963  ;;  %v1400_v42 = vmul.f32 1.442695, %v1380_v37  ;;  %v1381_v43 = vsub.f32 %v2690_v7, %v2746_v40 }
 0x656   :  { %v2750_v44 = vpop.xlane.xlu0 %1364  ;;  %1428 = vadd.xlane.f32.xlu0 %v1964_v41  ;;  %v1966_v48 = vpop.eup %1965 }
 0x657   :  { %1973 = vpow2.f32 %v1400_v42  ;;  %v1386_v45 = vsub.f32 %v2693_v3, %v2750_v44  ;;  %v1402_v46 = vmul.f32 1.442695, %v1381_v43 }
 0x658   :  { %1975 = vpow2.f32 %v1406_v38  ;;  %v2754_v47 = vpop.xlane.xlu1 %1366 }
 0x659   :  { %v1412_v49 = vmul.f32 1.442695, %v1386_v45  ;;  %v1387_v50 = vsub.f32 %v2696_v11, %v2754_v47 }
 0x65a   :  { %v1968_v51 = vpop.eup %1967  ;;  %v2758_v54 = vpop.xlane.xlu0 %1360  ;;  %1424 = vadd.xlane.f32.xlu0 %v1966_v48 }
 0x65b   :  { %1977 = vpow2.f32 %v1412_v49  ;;  %v1384_v53 = vsub.f32 %v2699_v16, %v2758_v54  ;;  %1430 = vadd.xlane.f32.xlu1 %v1968_v51  ;;  %v1414_v56 = vmul.f32 1.442695, %v1387_v50 }
 0x65c   :  { %1979 = vpow2.f32 %v1402_v46  ;;  %v2762_v57 = vpop.xlane.xlu1 %1362 }
 0x65d   :  { %v1970_v63 = vpop.eup %1969  ;;  %v1408_v2 = vmul.f32 1.442695, %v1384_v53  ;;  %v1385_v0 = vsub.f32 %v2702_v17, %v2762_v57 }
 0x65e   :  { %v1972_v5 = vpop.eup %1971  ;;  %1436 = vadd.xlane.f32.xlu0 %v1970_v63 }
 0x65f   :  { %1981 = vpow2.f32 %v1408_v2  ;;  %v1410_v9 = vmul.f32 1.442695, %v1385_v0  ;;  %1426 = vadd.xlane.f32.xlu1 %v1972_v5  ;;  %v2766_v1 = vpop.xlane.xlu0 %1368 }
 0x660   :  { %1983 = vpow2.f32 %v1414_v56  ;;  %v1388_v10 = vsub.f32 %v2706_v19, %v2766_v1 }
 0x661   :  { %v1974_v13 = vpop.eup %1973  ;;  %v2770_v12 = vpop.xlane.xlu1 %1370  ;;  %1985 = vpow2.f32 %v1410_v9 }
 0x662   :  { %v1976_v62 = vpop.eup %1975  ;;  %v1416_v23 = vmul.f32 1.442695, %v1388_v10  ;;  %v1389_v8 = vsub.f32 %v2708_v24, %v2770_v12  ;;  %1432 = vadd.xlane.f32.xlu0 %v1974_v13 }
 0x663   :  { %1438 = vadd.xlane.f32.xlu1 %v1976_v62  ;;  %v2774_v27 = vpop.xlane.xlu0 %1372 }
 0x664   :  { %1987 = vpow2.f32 %v1416_v23  ;;  %v1418_v29 = vmul.f32 1.442695, %v1389_v8  ;;  %v1390_v30 = vsub.f32 %v2711_v25, %v2774_v27 }
 0x665   :  { %v1978_v31 = vpop.eup %1977  ;;  %v2778_v22 = vpop.xlane.xlu1 %1374 }
 0x666   :  { %v1980_v34 = vpop.eup %1979  ;;  %v1420_v39 = vmul.f32 1.442695, %v1390_v30  ;;  %v1391_v18 = vsub.f32 %v2714_v20, %v2778_v22  ;;  %1444 = vadd.xlane.f32.xlu0 %v1978_v31  ;;  %1989 = vpow2.f32 %v1418_v29 }
 0x667   :  { %1434 = vadd.xlane.f32.xlu1 %v1980_v34 }
 0x668   :  { %1991 = vpow2.f32 %v1420_v39  ;;  %v1422_v21 = vmul.f32 1.442695, %v1391_v18 }
 0x669   :  { %v1982_v33 = vpop.eup %1981 }
 0x66a   :  { %v1984_v35 = vpop.eup %1983  ;;  %1440 = vadd.xlane.f32.xlu0 %v1982_v33  ;;  %1993 = vpow2.f32 %v1422_v21 }
 0x66b   :  { %1446 = vadd.xlane.f32.xlu1 %v1984_v35  ;;  %v1986_v37 = vpop.eup %1985 }
 0x66e   :  { %v1988_v38 = vpop.eup %1987 }
 0x66f   :  { %1442 = vadd.xlane.f32.xlu1 %v1986_v37  ;;  %1448 = vadd.xlane.f32.xlu0 %v1988_v38 }
 0x670   :  { %v1990_v41 = vpop.eup %1989 }
 0x672   :  { %v1992_v42 = vpop.eup %1991 }
 0x673   :  { %1450 = vadd.xlane.f32.xlu1 %v1990_v41  ;;  %1452 = vadd.xlane.f32.xlu0 %v1992_v42 }
 0x674   :  { %v1994_v43 = vpop.eup %1993 }
 0x677   :  { %1454 = vadd.xlane.f32.xlu1 %v1994_v43 }
 0x6e3   :  { %v1429_v45 = vpop.xlane.xlu0 %1428 }
 0x6e4   :  { %1995 = vlog2.f32 %v1429_v45 }
 0x6e7   :  { %v1425_v46 = vpop.xlane.xlu0 %1424 }
 0x6e8   :  { %1997 = vlog2.f32 %v1425_v46  ;;  %v1431_v48 = vpop.xlane.xlu1 %1430 }
 0x6e9   :  { %1999 = vlog2.f32 %v1431_v48 }
 0x6eb   :  { %v1437_v49 = vpop.xlane.xlu0 %1436 }
 0x6ec   :  { %2001 = vlog2.f32 %v1437_v49  ;;  %v1427_v50 = vpop.xlane.xlu1 %1426 }
 0x6ed   :  { %2003 = vlog2.f32 %v1427_v50 }
 0x6ee   :  { %v1996_v51 = vpop.eup %1995 }
 0x6ef   :  { %v1461_v53 = vmul.f32 0.6931472, %v1996_v51  ;;  %v1433_v56 = vpop.xlane.xlu0 %1432 }
 0x6f0   :  { %2005 = vlog2.f32 %v1433_v56  ;;  %v1439_v63 = vpop.xlane.xlu1 %1438 }
 0x6f1   :  { %v1490_v2 = vadd.f32 %v1461_v53, %v2718_v26  ;;  %2007 = vlog2.f32 %v1439_v63 }
 0x6f2   :  { %v1998_v0 = vpop.eup %1997 }
 0x6f3   :  { %v2000_v5 = vpop.eup %1999  ;;  %v1506_v9 = vsub.f32 %v2670_v52, %v1490_v2  ;;  %v1457_v10 = vmul.f32 0.6931472, %v1998_v0  ;;  %v1445_v13 = vpop.xlane.xlu0 %1444 }
 0x6f4   :  { %v1463_v62 = vmul.f32 0.6931472, %v2000_v5  ;;  %2009 = vlog2.f32 %v1445_v13  ;;  %v1435_v23 = vpop.xlane.xlu1 %1434 }
 0x6f5   :  { %1522 = vst [vmem:[#allocation8 + $0x10] sm:$0xff] %v1506_v9  ;;  %v1488_v8 = vadd.f32 %v1457_v10, %v2722_v28  ;;  %2011 = vlog2.f32 %v1435_v23 }
 0x6f6   :  { %v2002_v29 = vpop.eup %2001  ;;  %v1491_v30 = vadd.f32 %v1463_v62, %v2728_v32 }
 0x6f7   :  { %v2004_v31 = vpop.eup %2003  ;;  %v1504_v26 = vsub.f32 %v2672_v55, %v1488_v8  ;;  %v1469_v34 = vmul.f32 0.6931472, %v2002_v29  ;;  %v1441_v39 = vpop.xlane.xlu0 %1440 }
 0x6f8   :  { %v1507_v18 = vsub.f32 %v2678_v60, %v1491_v30  ;;  %v1459_v52 = vmul.f32 0.6931472, %v2004_v31  ;;  %2013 = vlog2.f32 %v1441_v39  ;;  %v1447_v21 = vpop.xlane.xlu1 %1446 }
 0x6f9   :  { %1520 = vst [vmem:[#allocation8] sm:$0xff] %v1504_v26  ;;  %v1494_v33 = vadd.f32 %v1469_v34, %v2734_v15  ;;  %2015 = vlog2.f32 %v1447_v21 }
 0x6fa   :  { %v2006_v35 = vpop.eup %2005  ;;  %1523 = vst [vmem:[#allocation8 + $0x18] sm:$0xff] %v1507_v18  ;;  %v1489_v28 = vadd.f32 %v1459_v52, %v2726_v58 }
 0x6fb   :  { %v2008_v37 = vpop.eup %2007  ;;  %v1510_v32 = vsub.f32 %v2682_v14, %v1494_v33  ;;  %v1465_v38 = vmul.f32 0.6931472, %v2006_v35 }
 0x6fc   :  { %v1505_v55 = vsub.f32 %v2675_v59, %v1489_v28  ;;  %v1471_v41 = vmul.f32 0.6931472, %v2008_v37  ;;  %v1443_v42 = vpop.xlane.xlu1 %1442  ;;  %v1449_v60 = vpop.xlane.xlu0 %1448 }
 0x6fd   :  { %1526 = vst [vmem:[#allocation8 + $0x30] sm:$0xff] %v1510_v32  ;;  %v1492_v43 = vadd.f32 %v1465_v38, %v2742_v36  ;;  %2017 = vlog2.f32 %v1443_v42 }
 0x6fe   :  { %v2010_v45 = vpop.eup %2009  ;;  %1521 = vst [vmem:[#allocation8 + $0x8] sm:$0xff] %v1505_v55  ;;  %v1495_v15 = vadd.f32 %v1471_v41, %v2738_v61  ;;  %2019 = vlog2.f32 %v1449_v60 }
 0x6ff   :  { %v2012_v46 = vpop.eup %2011  ;;  %v1508_v58 = vsub.f32 %v2687_v6, %v1492_v43  ;;  %v1477_v48 = vmul.f32 0.6931472, %v2010_v45 }
 0x700   :  { %v1511_v14 = vsub.f32 %v2684_v4, %v1495_v15  ;;  %v1467_v49 = vmul.f32 0.6931472, %v2012_v46  ;;  %v1451_v59 = vpop.xlane.xlu1 %1450  ;;  %v1453_v50 = vpop.xlane.xlu0 %1452 }
 0x701   :  { %1524 = vst [vmem:[#allocation8 + $0x20] sm:$0xff] %v1508_v58  ;;  %v1498_v51 = vadd.f32 %v1477_v48, %v2750_v44  ;;  %2021 = vlog2.f32 %v1451_v59 }
 0x702   :  { %v2014_v36 = vpop.eup %2013  ;;  %1527 = vst [vmem:[#allocation8 + $0x38] sm:$0xff] %v1511_v14  ;;  %v1493_v53 = vadd.f32 %v1467_v49, %v2746_v40  ;;  %2023 = vlog2.f32 %v1453_v50 }
 0x703   :  { %v2016_v61 = vpop.eup %2015  ;;  %v1514_v56 = vsub.f32 %v2693_v3, %v1498_v51  ;;  %v1473_v63 = vmul.f32 0.6931472, %v2014_v36 }
 0x704   :  { %v1509_v6 = vsub.f32 %v2690_v7, %v1493_v53  ;;  %v1479_v2 = vmul.f32 0.6931472, %v2016_v61  ;;  %v1455_v4 = vpop.xlane.xlu1 %1454 }
 0x705   :  { %1530 = vst [vmem:[#allocation8 + $0x50] sm:$0xff] %v1514_v56  ;;  %v1496_v0 = vadd.f32 %v1473_v63, %v2758_v54  ;;  %2025 = vlog2.f32 %v1455_v4 }
 0x706   :  { %1525 = vst [vmem:[#allocation8 + $0x28] sm:$0xff] %v1509_v6  ;;  %v1499_v44 = vadd.f32 %v1479_v2, %v2754_v47 }
 0x707   :  { %v2018_v5 = vpop.eup %2017  ;;  %v1512_v9 = vsub.f32 %v2699_v16, %v1496_v0 }
 0x708   :  { %v2020_v40 = vpop.eup %2019  ;;  %v1515_v10 = vsub.f32 %v2696_v11, %v1499_v44  ;;  %v1475_v13 = vmul.f32 0.6931472, %v2018_v5 }
 0x709   :  { %1528 = vst [vmem:[#allocation8 + $0x40] sm:$0xff] %v1512_v9  ;;  %v1481_v3 = vmul.f32 0.6931472, %v2020_v40 }
 0x70a   :  { %1531 = vst [vmem:[#allocation8 + $0x58] sm:$0xff] %v1515_v10  ;;  %v1497_v7 = vadd.f32 %v1475_v13, %v2762_v57 }
 0x70b   :  { %v2022_v62 = vpop.eup %2021  ;;  %v1500_v23 = vadd.f32 %v1481_v3, %v2766_v1 }
 0x70c   :  { %v2024_v54 = vpop.eup %2023  ;;  %v1513_v8 = vsub.f32 %v2702_v17, %v1497_v7  ;;  %v1483_v29 = vmul.f32 0.6931472, %v2022_v62 }
 0x70d   :  { %v1516_v47 = vsub.f32 %v2706_v19, %v1500_v23  ;;  %v1485_v30 = vmul.f32 0.6931472, %v2024_v54 }
 0x70e   :  { %1529 = vst [vmem:[#allocation8 + $0x48] sm:$0xff] %v1513_v8  ;;  %v1501_v16 = vadd.f32 %v1483_v29, %v2770_v12 }
 0x70f   :  { %v2026_v11 = vpop.eup %2025  ;;  %1532 = vst [vmem:[#allocation8 + $0x60] sm:$0xff] %v1516_v47  ;;  %v1502_v31 = vadd.f32 %v1485_v30, %v2774_v27 }
 0x710   :  { %v1517_v26 = vsub.f32 %v2708_v24, %v1501_v16  ;;  %v1487_v57 = vmul.f32 0.6931472, %v2026_v11 }
 0x711   :  { %v1518_v34 = vsub.f32 %v2711_v25, %v1502_v31 }
 0x712   :  { %1533 = vst [vmem:[#allocation8 + $0x68] sm:$0xff] %v1517_v26  ;;  %v1503_v17 = vadd.f32 %v1487_v57, %v2778_v22 }
 0x713   :  { %1534 = vst [vmem:[#allocation8 + $0x70] sm:$0xff] %v1518_v34 }
 0x714   :  { %v1519_v19 = vsub.f32 %v2714_v20, %v1503_v17 }
 0x716   :  { %1535 = vst [vmem:[#allocation8 + $0x78] sm:$0xff] %v1519_v19 }
 0x717   :  { %2104 = shalt.err (!%p2101_p0)
}
 0x718   :  { %s2105_s21 = scalar_lea.hbm %s2832_s6, 2048 }
 0x719   :  { %p2106_p1 = scmp.ne.s32.totalorder %s2832_s6, %s2105_s21  ;;  %p2109_p2 = scmp.lt.u32.totalorder %s2105_s21, %s2832_s6 }
 0x71b   :  { %p2111_p3 = pnand %p2109_p2, %p2106_p1 }
 0x71d   :  { %2114 = shalt.err (!%p2111_p3)
}
 0x71e   :  { %s2132_s27 = smov 128   ;;  %s2133_s28 = smov 8  }
 0x71f   :  { %1547 = dma.vmem_to_hbm [thread:$0]  %s1542_s18, 2048, %s2832_s6, [#allocation4], %s2132_s27, %s2132_s27, %s2133_s28  }
 0x720   :  { %2119 = dma.done.wait [#allocation4], 2048  }
 0x721   :  { %2120 = vsyncadd [#allocation4], 4294965248 }
 0x722   :  { %1551 = vsyncpa [#allocation3], 1 }
 0x723   :  { %1552 = vsyncpa [#allocation6], 1 }
 0x724   :  { %1553 = vsyncpa [#allocation4], 1 }

</bundles_post_ra>
